<compile_context>
chip_gen: v7x
topology: tpu7x:2x2x1
jax: 0.10.0
libtpu: 0.0.40
codegen_flags: <defaults>
</compile_context>

<pallas_src>
import jax
import jax.numpy as jnp
from jax.experimental import pallas as pl
from jax.experimental.pallas import tpu as pltpu

BN_EPS = 1e-5
VMEM_LIMIT = 64 * 1024 * 1024


# ----------------------------------------------------------------------------- helpers
def _round_up(x, m):
    return -(-x // m) * m


def get_groupsize(channels, min_channels, gamma, M):
    final_gamma = gamma
    groups = gamma * M
    while (channels // groups < min_channels or channels % groups != 0) and final_gamma > 1:
        final_gamma -= 1
        groups = final_gamma * M
    return groups


def pack_conv_weight(w, groups):
    """PyTorch grouped conv weight (Cout, Cin//G, kh, kw) -> (kh*kw, Gc, cin_g, cout_g).

    If per-group channels are MXU-friendly (multiples of 128) keep groups separate
    (Gc = G, kernel loops over groups -> no wasted G x MXU FLOPs).  Otherwise fold the
    groups into one block-diagonal dense weight (Gc = 1)."""
    Cout, cin_g, kh, kw = w.shape
    cout_g = Cout // groups
    if groups > 1 and cin_g % 128 == 0 and cout_g % 128 == 0:
        wg = w.reshape(groups, cout_g, cin_g, kh, kw)
        return jnp.transpose(wg, (3, 4, 0, 2, 1)).reshape(kh * kw, groups, cin_g, cout_g)
    Cin = cin_g * groups
    dense = jnp.zeros((kh, kw, Cin, Cout), w.dtype)
    for g in range(groups):
        blk = jnp.transpose(w[g * cout_g:(g + 1) * cout_g], (2, 3, 1, 0))
        dense = dense.at[:, :, g * cin_g:(g + 1) * cin_g,
                         g * cout_g:(g + 1) * cout_g].set(blk)
    return dense.reshape(kh * kw, 1, Cin, Cout)


# -------------------------------------------------------------------- in-kernel helpers
def _conv_taps(get_tap, w_ref, n_taps, P):
    """Per-tap accumulating MXU matmuls (single (P, cout) f32 accumulator, no im2col
    concat), looping over weight groups.  w_ref: (n_taps, G, cin_g, cout_g) bf16."""
    _, G, cin_g, cout_g = w_ref.shape
    outs = []
    for g in range(G):
        acc = jnp.zeros((P, cout_g), jnp.float32)
        for t in range(n_taps):
            acc = acc + jnp.dot(get_tap(t, g, cin_g), w_ref[t, g],
                                preferred_element_type=jnp.float32)
        outs.append(acc)
    return outs[0] if G == 1 else jnp.concatenate(outs, axis=1)


def _tile_stats(y):
    """Per-tile BN partials [sum, M2]; M2 = sum((y - tile_mean)^2)  (two-pass variance)."""
    n = y.shape[0]
    mu = jnp.mean(y, axis=0, keepdims=True)
    d = y - mu
    return jnp.concatenate([mu * n, jnp.sum(d * d, axis=0, keepdims=True)], axis=0)


# -------------------------------------------------------------------- kernel factories
def _make_conv1_kernel(s, Ho, Wo, Cout, has_sc_conv):
    P = Ho * Wo

    def body(xs_ref, w1_ref, *rest):
        if has_sc_conv:
            ws_ref, y1_ref, s1_ref, ysc_ref, ssc_ref = rest
        else:
            y1_ref, s1_ref = rest

        def tap1(t, g, cin_g):
            ki, kj = t // 3, t % 3
            di, pi = ki // s, ki % s
            dj, pj = kj // s, kj % s
            ph = pi * s + pj
            return xs_ref[ph, 0, di:di + Ho, dj:dj + Wo,
                          g * cin_g:(g + 1) * cin_g].reshape(P, cin_g)

        y1 = _conv_taps(tap1, w1_ref, 9, P)                       # (P, Cout) f32
        y1_ref[...] = y1.reshape(1, Ho, Wo, Cout).astype(y1_ref.dtype)
        s1_ref[...] = _tile_stats(y1).reshape(1, 2, Cout)

        if has_sc_conv:
            # 1x1 conv, stride s, pad 0: padded pixel (s*i+1, s*j+1).
            d1, p1 = 1 // s, 1 % s
            ph = p1 * s + p1

            def tap_sc(t, g, cin_g):
                return xs_ref[ph, 0, d1:d1 + Ho, d1:d1 + Wo,
                              g * cin_g:(g + 1) * cin_g].reshape(P, cin_g)

            ysc = _conv_taps(tap_sc, ws_ref, 1, P)
            ysc_ref[...] = ysc.reshape(1, Ho, Wo, Cout).astype(ysc_ref.dtype)
            ssc_ref[...] = _tile_stats(ysc).reshape(1, 2, Cout)

    return body


def _make_conv2_kernel(Ho, Wo, Cout):
    P = Ho * Wo

    def body(y1_ref, sc1_ref, sh1_ref, w2_ref, y2_ref, s2_ref, pad_ref):
        # BN1-apply + ReLU (f32), stored bf16 into a zero-haloed scratch.
        a = y1_ref[0].astype(jnp.float32).reshape(P, Cout)
        a = jnp.maximum(a * sc1_ref[...] + sh1_ref[...], 0.0)
        pad_ref[...] = jnp.zeros(pad_ref.shape, pad_ref.dtype)    # single full zero
        pad_ref[1:Ho + 1, 1:Wo + 1, :] = a.reshape(Ho, Wo, Cout).astype(pad_ref.dtype)

        def tap2(t, g, cin_g):
            ki, kj = t // 3, t % 3
            return pad_ref[ki:ki + Ho, kj:kj + Wo,
                           g * cin_g:(g + 1) * cin_g].reshape(P, cin_g)

        y2 = _conv_taps(tap2, w2_ref, 9, P)
        y2_ref[...] = y2.reshape(1, Ho, Wo, Cout).astype(y2_ref.dtype)
        s2_ref[...] = _tile_stats(y2).reshape(1, 2, Cout)

    return body


def _make_final_kernel(Ho, Wo, Cout, has_sc_conv):
    def body(*refs):
        if has_sc_conv:
            y2_ref, ysc_ref, sc2_ref, sh2_ref, scS_ref, shS_ref, out_ref = refs
            sc = ysc_ref[0].astype(jnp.float32) * scS_ref[...] + shS_ref[...]
        else:
            y2_ref, xid_ref, sc2_ref, sh2_ref, out_ref = refs
            sc = xid_ref[0]                                       # exact f32 identity residual
        y = y2_ref[0].astype(jnp.float32) * sc2_ref[...] + sh2_ref[...]
        out = jnp.maximum(y + sc, 0.0)                            # (Ho, Wo, Cout)
        out_ref[...] = out.reshape(1, Ho, Wo * Cout)              # lane-dense store

    return body


# -------------------------------------------------------------- wrapper-side BN helpers
def _combine_stats(partials, n_per_tile):
    """Combine per-tile [sum, M2] partials across tiles (Chan's parallel variance)."""
    sums = partials[:, 0, :]
    m2s = partials[:, 1, :]
    n_tiles = partials.shape[0]
    total = n_tiles * n_per_tile
    mean = jnp.sum(sums, axis=0) / total
    tile_mean = sums / n_per_tile
    m2 = jnp.sum(m2s, axis=0) + n_per_tile * jnp.sum((tile_mean - mean[None, :]) ** 2, axis=0)
    var = m2 / total                         # biased variance (BN training normalization)
    return mean, var


def _bn_scale_shift(mean, var, g, b):
    scale = g.astype(jnp.float32) * jax.lax.rsqrt(var + BN_EPS)
    shift = b.astype(jnp.float32) - mean * scale
    return scale.reshape(1, -1), shift.reshape(1, -1)


# ----------------------------------------------------------------------------- wrapper
def packed_basic_block_forward(params, x_nchw, cfg):
    N, Cin, H, W = x_nchw.shape
    s = cfg['stride']
    Cout = cfg['out_channels']
    Ho = (H - 1) // s + 1
    Wo = (W - 1) // s + 1
    has_sc_conv = (s != 1)

    # Padded space-to-depth sizes: per-phase extent must cover Ho + max tap offset (2//s);
    # the padded image must contain the H+2 / W+2 zero-padded content. W-phase rounded up
    # to a multiple of 8 for sublane-friendlier window slices.
    Hh = max(-(-(H + 2) // s), Ho + (2 // s))
    Wh = _round_up(max(-(-(W + 2) // s), Wo + (2 // s)), 8)
    Hp, Wp = s * Hh, s * Wh

    x_nhwc = jnp.transpose(x_nchw, (0, 2, 3, 1)).astype(jnp.float32)
    x_pad = jnp.pad(x_nhwc, ((0, 0), (1, Hp - H - 1), (1, Wp - W - 1), (0, 0)))
    xs = x_pad.reshape(N, Hh, s, Wh, s, Cin).transpose(2, 4, 0, 1, 3, 5)
    xs = xs.reshape(s * s, N, Hh, Wh, Cin).astype(jnp.bfloat16)        # bf16 activations

    w1 = pack_conv_weight(params['w1'], cfg['g_conv1']).astype(jnp.bfloat16)
    w2 = pack_conv_weight(params['w2'], cfg['g_conv2']).astype(jnp.bfloat16)

    grid = (N,)                                    # one image per grid step (halo-free)
    cparams = pltpu.CompilerParams(dimension_semantics=("parallel",),
                                   vmem_limit_bytes=VMEM_LIMIT)

    xs_spec = pl.BlockSpec((s * s, 1, Hh, Wh, Cin), lambda i: (0, i, 0, 0, 0))
    w1_spec = pl.BlockSpec(w1.shape, lambda i: (0, 0, 0, 0))
    w2_spec = pl.BlockSpec(w2.shape, lambda i: (0, 0, 0, 0))
    y_spec = pl.BlockSpec((1, Ho, Wo, Cout), lambda i: (i, 0, 0, 0))
    st_spec = pl.BlockSpec((1, 2, Cout), lambda i: (i, 0, 0))
    vec_spec = pl.BlockSpec((1, Cout), lambda i: (0, 0))

    y_shape = jax.ShapeDtypeStruct((N, Ho, Wo, Cout), jnp.bfloat16)
    st_shape = jax.ShapeDtypeStruct((N, 2, Cout), jnp.float32)

    # ---- call 1: conv1 (+ shortcut conv), per-tile BN partials -----------------------
    kernel1 = _make_conv1_kernel(s, Ho, Wo, Cout, has_sc_conv)
    if has_sc_conv:
        ws = pack_conv_weight(params['ws'], cfg['g_sc']).astype(jnp.bfloat16)
        ws_spec = pl.BlockSpec(ws.shape, lambda i: (0, 0, 0, 0))
        y1, st1, ysc, stsc = pl.pallas_call(
            kernel1, grid=grid,
            in_specs=[xs_spec, w1_spec, ws_spec],
            out_specs=[y_spec, st_spec, y_spec, st_spec],
            out_shape=[y_shape, st_shape, y_shape, st_shape],
            compiler_params=cparams,
        )(xs, w1, ws)
    else:
        y1, st1 = pl.pallas_call(
            kernel1, grid=grid,
            in_specs=[xs_spec, w1_spec],
            out_specs=[y_spec, st_spec],
            out_shape=[y_shape, st_shape],
            compiler_params=cparams,
        )(xs, w1)

    P_tile = Ho * Wo
    mean1, var1 = _combine_stats(st1, P_tile)
    scale1, shift1 = _bn_scale_shift(mean1, var1, params['g1'], params['b1'])

    # ---- call 2: BN1 + ReLU + conv2, per-tile BN2 partials ---------------------------
    Wsc = _round_up(Wo + 2, 8)
    kernel2 = _make_conv2_kernel(Ho, Wo, Cout)
    y2, st2 = pl.pallas_call(
        kernel2, grid=grid,
        in_specs=[y_spec, vec_spec, vec_spec, w2_spec],
        out_specs=[y_spec, st_spec],
        out_shape=[y_shape, st_shape],
        scratch_shapes=[pltpu.VMEM((Ho + 2, Wsc, Cout), jnp.bfloat16)],
        compiler_params=cparams,
    )(y1, scale1, shift1, w2)

    mean2, var2 = _combine_stats(st2, P_tile)
    scale2, shift2 = _bn_scale_shift(mean2, var2, params['g2'], params['b2'])

    # ---- call 3: BN2 + shortcut + residual + ReLU (lane-dense output slab) -----------
    kernel3 = _make_final_kernel(Ho, Wo, Cout, has_sc_conv)
    out_shape = jax.ShapeDtypeStruct((N, Ho, Wo * Cout), jnp.float32)
    out_spec = pl.BlockSpec((1, Ho, Wo * Cout), lambda i: (i, 0, 0))
    if has_sc_conv:
        mean_s, var_s = _combine_stats(stsc, P_tile)
        scale_s, shift_s = _bn_scale_shift(mean_s, var_s, params['gs'], params['bs'])
        out = pl.pallas_call(
            kernel3, grid=grid,
            in_specs=[y_spec, y_spec, vec_spec, vec_spec, vec_spec, vec_spec],
            out_specs=out_spec, out_shape=out_shape,
            compiler_params=cparams,
        )(y2, ysc, scale2, shift2, scale_s, shift_s)
    else:
        # identity shortcut (stride == 1); like the PyTorch module this assumes Cin == Cout.
        xid_spec = pl.BlockSpec((1, Ho, Wo, Cout), lambda i: (i, 0, 0, 0))
        out = pl.pallas_call(
            kernel3, grid=grid,
            in_specs=[y_spec, xid_spec, vec_spec, vec_spec],
            out_specs=out_spec, out_shape=out_shape,
            compiler_params=cparams,
        )(y2, x_nhwc, scale2, shift2)

    out = out.reshape(N, Ho, Wo, Cout)
    return jnp.transpose(out, (0, 3, 1, 2))                       # back to NCHW


# --------------------------------------------------------- deterministic parameter init
def init_packed_basic_block(key, input_channels, output_channels, stride=1,
                            alpha=1, M=1, gamma=1, min_channels=64):
    input_channels *= alpha
    output_channels *= alpha
    g1 = M
    g2 = get_groupsize(output_channels, min_channels, gamma, M)
    gsc = get_groupsize(input_channels, min_channels, gamma, M)
    ks = jax.random.split(key, 9)
    params = {
        'w1': 0.2 * jax.random.normal(ks[0], (output_channels, input_channels // g1, 3, 3), jnp.float32),
        'w2': 0.2 * jax.random.normal(ks[1], (output_channels, output_channels // g2, 3, 3), jnp.float32),
        'g1': 1.0 + 0.1 * jax.random.normal(ks[2], (output_channels,), jnp.float32),
        'b1': 0.1 * jax.random.normal(ks[3], (output_channels,), jnp.float32),
        'g2': 1.0 + 0.1 * jax.random.normal(ks[4], (output_channels,), jnp.float32),
        'b2': 0.1 * jax.random.normal(ks[5], (output_channels,), jnp.float32),
    }
    if stride != 1:
        params['ws'] = 0.2 * jax.random.normal(ks[6], (output_channels, input_channels // gsc, 1, 1), jnp.float32)
        params['gs'] = 1.0 + 0.1 * jax.random.normal(ks[7], (output_channels,), jnp.float32)
        params['bs'] = 0.1 * jax.random.normal(ks[8], (output_channels,), jnp.float32)
    cfg = {'stride': stride, 'in_channels': input_channels, 'out_channels': output_channels,
           'g_conv1': g1, 'g_conv2': g2, 'g_sc': gsc}
    return params, cfg


# ---------------------------------------------------------------- pure-JAX reference
def _conv(x, w, stride, padding, groups):
    return jax.lax.conv_general_dilated(
        x, w, window_strides=(stride, stride),
        padding=((padding, padding), (padding, padding)),
        dimension_numbers=('NCHW', 'OIHW', 'NCHW'),
        feature_group_count=groups,
        precision=jax.lax.Precision.HIGHEST)


def _bn_train_nchw(x, g, b):
    mu = x.mean(axis=(0, 2, 3), keepdims=True)
    var = ((x - mu) ** 2).mean(axis=(0, 2, 3), keepdims=True)
    return (x - mu) / jnp.sqrt(var + BN_EPS) * g.reshape(1, -1, 1, 1) + b.reshape(1, -1, 1, 1)


def reference_forward(params, x, cfg):
    s = cfg['stride']
    out = _conv(x, params['w1'], s, 1, cfg['g_conv1'])
    out = jax.nn.relu(_bn_train_nchw(out, params['g1'], params['b1']))
    out = _conv(out, params['w2'], 1, 1, cfg['g_conv2'])
    out = _bn_train_nchw(out, params['g2'], params['b2'])
    if s != 1:
        sc = _bn_train_nchw(_conv(x, params['ws'], s, 0, cfg['g_sc']),
                            params['gs'], params['bs'])
    else:
        sc = x
    return jax.nn.relu(out + sc)


# ----------------------------------------------------------------------------- main
if __name__ == "__main__":
    key = jax.random.PRNGKey(0)
    kp1, kp2, kp3, kx1, kx2, kx3 = jax.random.split(key, 6)

    # Test 1: PackedBasicBlock(4, 8, stride=2, alpha=1, M=2, gamma=1, minChannels=2)
    params, cfg = init_packed_basic_block(kp1, 4, 8, stride=2,
                                          alpha=1, M=2, gamma=1, min_channels=2)
    x = jax.random.normal(kx1, (2, 4, 16, 16), jnp.float32)
    out = jax.block_until_ready(packed_basic_block_forward(params, x, cfg))
    ref = jax.block_until_ready(reference_forward(params, x, cfg))
    assert out.shape == ref.shape == (2, 8, 8, 8), (out.shape, ref.shape)
    err = float(jnp.max(jnp.abs(out - ref)))
    assert err < 3e-2, f"stride=2 max abs error too large: {err}"

    # Test 2: stride=1 identity-shortcut path (Cin == Cout)
    params1, cfg1 = init_packed_basic_block(kp2, 8, 8, stride=1,
                                            alpha=1, M=2, gamma=1, min_channels=2)
    x1 = jax.random.normal(kx2, (2, 8, 16, 16), jnp.float32)
    out_b = jax.block_until_ready(packed_basic_block_forward(params1, x1, cfg1))
    ref_b = jax.block_until_ready(reference_forward(params1, x1, cfg1))
    assert out_b.shape == ref_b.shape == (2, 8, 16, 16), (out_b.shape, ref_b.shape)
    err_b = float(jnp.max(jnp.abs(out_b - ref_b)))
    assert err_b < 3e-2, f"stride=1 max abs error too large: {err_b}"

    # Test 3: wide channels exercising the group-looped matmul path (128 channels/group).
    # bf16 matmul operands + bf16 activation storage -> slightly looser tolerance.
    params2, cfg2 = init_packed_basic_block(kp3, 256, 256, stride=1,
                                            alpha=1, M=2, gamma=1, min_channels=64)
    x2 = jax.random.normal(kx3, (1, 256, 8, 8), jnp.float32)
    out_c = jax.block_until_ready(packed_basic_block_forward(params2, x2, cfg2))
    ref_c = jax.block_until_ready(reference_forward(params2, x2, cfg2))
    assert out_c.shape == ref_c.shape == (1, 256, 8, 8), (out_c.shape, ref_c.shape)
    err_c = float(jnp.max(jnp.abs(out_c - ref_c)))
    assert err_c < 6e-2, f"grouped wide max abs error too large: {err_c}"

    print("KERNEL_OK")
</pallas_src>

<mosaic_0001>
module attributes {stable_mosaic.version = 11 : i64} {
  func.func @body(%arg0: i32, %arg1: memref<4x1x9x16x4xbf16, #tpu.memory_space<vmem>>, %arg2: memref<9x1x4x8xbf16, #tpu.memory_space<vmem>>, %arg3: memref<1x1x4x8xbf16, #tpu.memory_space<vmem>>, %arg4: memref<1x8x8x8xbf16, #tpu.memory_space<vmem>>, %arg5: memref<1x2x8xf32, #tpu.memory_space<vmem>>, %arg6: memref<1x8x8x8xbf16, #tpu.memory_space<vmem>>, %arg7: memref<1x2x8xf32, #tpu.memory_space<vmem>>) attributes {dimension_semantics = [#tpu.dimension_semantics<parallel>], iteration_bounds = array<i64: 2>, scalar_prefetch = 0 : i64, scratch_operands = 0 : i64, tpu.core_type = #tpu.core_type<tc>, window_params = [{transform_indices = @transform_0, window_bounds = array<i64: 4, 1, 9, 16, 4>}, {pipeline_mode = #tpu.pipeline_mode<synchronous>, transform_indices = @transform_1, window_bounds = array<i64: 9, 1, 4, 8>}, {pipeline_mode = #tpu.pipeline_mode<synchronous>, transform_indices = @transform_2, window_bounds = array<i64: 1, 1, 4, 8>}, {transform_indices = @transform_3, window_bounds = array<i64: 1, 8, 8, 8>}, {transform_indices = @transform_4, window_bounds = array<i64: 1, 2, 8>}, {transform_indices = @transform_5, window_bounds = array<i64: 1, 8, 8, 8>}, {transform_indices = @transform_6, window_bounds = array<i64: 1, 2, 8>}]} {
    %cst = arith.constant 0.000000e+00 : f32
    %0 = vector.broadcast %cst : f32 to vector<64x8xf32>
    %c0 = arith.constant 0 : index
    %c0_0 = arith.constant 0 : index
    %c0_1 = arith.constant 0 : index
    %c0_2 = arith.constant 0 : index
    %c0_3 = arith.constant 0 : index
    %1 = vector.load %arg1[%c0, %c0_0, %c0_1, %c0_2, %c0_3] : memref<4x1x9x16x4xbf16, #tpu.memory_space<vmem>>, vector<1x1x8x8x4xbf16>
    %2 = vector.shape_cast %1 : vector<1x1x8x8x4xbf16> to vector<8x8x4xbf16>
    %3 = vector.shape_cast %2 : vector<8x8x4xbf16> to vector<64x4xbf16>
    %c0_4 = arith.constant 0 : index
    %c0_5 = arith.constant 0 : index
    %c0_6 = arith.constant 0 : index
    %c0_7 = arith.constant 0 : index
    %4 = vector.load %arg2[%c0_4, %c0_5, %c0_6, %c0_7] : memref<9x1x4x8xbf16, #tpu.memory_space<vmem>>, vector<1x1x4x8xbf16>
    %5 = vector.shape_cast %4 : vector<1x1x4x8xbf16> to vector<4x8xbf16>
    %cst_8 = arith.constant dense<0.000000e+00> : vector<64x8xf32>
    %6 = tpu.matmul %3, %5, %cst_8 {dimension_numbers = #tpu.dot_dimension_numbers<[1], [0], [0], [1], [0, 0, 1, 1], [], []>} : vector<64x4xbf16>, vector<4x8xbf16>, vector<64x8xf32> -> vector<64x8xf32>
    %7 = arith.addf %0, %6 : vector<64x8xf32>
    %c1 = arith.constant 1 : index
    %c0_9 = arith.constant 0 : index
    %c0_10 = arith.constant 0 : index
    %c0_11 = arith.constant 0 : index
    %c0_12 = arith.constant 0 : index
    %8 = vector.load %arg1[%c1, %c0_9, %c0_10, %c0_11, %c0_12] : memref<4x1x9x16x4xbf16, #tpu.memory_space<vmem>>, vector<1x1x8x8x4xbf16>
    %9 = vector.shape_cast %8 : vector<1x1x8x8x4xbf16> to vector<8x8x4xbf16>
    %10 = vector.shape_cast %9 : vector<8x8x4xbf16> to vector<64x4xbf16>
    %c1_13 = arith.constant 1 : index
    %c0_14 = arith.constant 0 : index
    %c0_15 = arith.constant 0 : index
    %c0_16 = arith.constant 0 : index
    %11 = vector.load %arg2[%c1_13, %c0_14, %c0_15, %c0_16] : memref<9x1x4x8xbf16, #tpu.memory_space<vmem>>, vector<1x1x4x8xbf16>
    %12 = vector.shape_cast %11 : vector<1x1x4x8xbf16> to vector<4x8xbf16>
    %cst_17 = arith.constant dense<0.000000e+00> : vector<64x8xf32>
    %13 = tpu.matmul %10, %12, %cst_17 {dimension_numbers = #tpu.dot_dimension_numbers<[1], [0], [0], [1], [0, 0, 1, 1], [], []>} : vector<64x4xbf16>, vector<4x8xbf16>, vector<64x8xf32> -> vector<64x8xf32>
    %14 = arith.addf %7, %13 : vector<64x8xf32>
    %c0_18 = arith.constant 0 : index
    %c0_19 = arith.constant 0 : index
    %c0_20 = arith.constant 0 : index
    %c1_21 = arith.constant 1 : index
    %c0_22 = arith.constant 0 : index
    %15 = vector.load %arg1[%c0_18, %c0_19, %c0_20, %c1_21, %c0_22] : memref<4x1x9x16x4xbf16, #tpu.memory_space<vmem>>, vector<1x1x8x8x4xbf16>
    %16 = vector.shape_cast %15 : vector<1x1x8x8x4xbf16> to vector<8x8x4xbf16>
    %17 = vector.shape_cast %16 : vector<8x8x4xbf16> to vector<64x4xbf16>
    %c2 = arith.constant 2 : index
    %c0_23 = arith.constant 0 : index
    %c0_24 = arith.constant 0 : index
    %c0_25 = arith.constant 0 : index
    %18 = vector.load %arg2[%c2, %c0_23, %c0_24, %c0_25] : memref<9x1x4x8xbf16, #tpu.memory_space<vmem>>, vector<1x1x4x8xbf16>
    %19 = vector.shape_cast %18 : vector<1x1x4x8xbf16> to vector<4x8xbf16>
    %cst_26 = arith.constant dense<0.000000e+00> : vector<64x8xf32>
    %20 = tpu.matmul %17, %19, %cst_26 {dimension_numbers = #tpu.dot_dimension_numbers<[1], [0], [0], [1], [0, 0, 1, 1], [], []>} : vector<64x4xbf16>, vector<4x8xbf16>, vector<64x8xf32> -> vector<64x8xf32>
    %21 = arith.addf %14, %20 : vector<64x8xf32>
    %c2_27 = arith.constant 2 : index
    %c0_28 = arith.constant 0 : index
    %c0_29 = arith.constant 0 : index
    %c0_30 = arith.constant 0 : index
    %c0_31 = arith.constant 0 : index
    %22 = vector.load %arg1[%c2_27, %c0_28, %c0_29, %c0_30, %c0_31] : memref<4x1x9x16x4xbf16, #tpu.memory_space<vmem>>, vector<1x1x8x8x4xbf16>
    %23 = vector.shape_cast %22 : vector<1x1x8x8x4xbf16> to vector<8x8x4xbf16>
    %24 = vector.shape_cast %23 : vector<8x8x4xbf16> to vector<64x4xbf16>
    %c3 = arith.constant 3 : index
    %c0_32 = arith.constant 0 : index
    %c0_33 = arith.constant 0 : index
    %c0_34 = arith.constant 0 : index
    %25 = vector.load %arg2[%c3, %c0_32, %c0_33, %c0_34] : memref<9x1x4x8xbf16, #tpu.memory_space<vmem>>, vector<1x1x4x8xbf16>
    %26 = vector.shape_cast %25 : vector<1x1x4x8xbf16> to vector<4x8xbf16>
    %cst_35 = arith.constant dense<0.000000e+00> : vector<64x8xf32>
    %27 = tpu.matmul %24, %26, %cst_35 {dimension_numbers = #tpu.dot_dimension_numbers<[1], [0], [0], [1], [0, 0, 1, 1], [], []>} : vector<64x4xbf16>, vector<4x8xbf16>, vector<64x8xf32> -> vector<64x8xf32>
    %28 = arith.addf %21, %27 : vector<64x8xf32>
    %c3_36 = arith.constant 3 : index
    %c0_37 = arith.constant 0 : index
    %c0_38 = arith.constant 0 : index
    %c0_39 = arith.constant 0 : index
    %c0_40 = arith.constant 0 : index
    %29 = vector.load %arg1[%c3_36, %c0_37, %c0_38, %c0_39, %c0_40] : memref<4x1x9x16x4xbf16, #tpu.memory_space<vmem>>, vector<1x1x8x8x4xbf16>
    %30 = vector.shape_cast %29 : vector<1x1x8x8x4xbf16> to vector<8x8x4xbf16>
    %31 = vector.shape_cast %30 : vector<8x8x4xbf16> to vector<64x4xbf16>
    %c4 = arith.constant 4 : index
    %c0_41 = arith.constant 0 : index
    %c0_42 = arith.constant 0 : index
    %c0_43 = arith.constant 0 : index
    %32 = vector.load %arg2[%c4, %c0_41, %c0_42, %c0_43] : memref<9x1x4x8xbf16, #tpu.memory_space<vmem>>, vector<1x1x4x8xbf16>
    %33 = vector.shape_cast %32 : vector<1x1x4x8xbf16> to vector<4x8xbf16>
    %cst_44 = arith.constant dense<0.000000e+00> : vector<64x8xf32>
    %34 = tpu.matmul %31, %33, %cst_44 {dimension_numbers = #tpu.dot_dimension_numbers<[1], [0], [0], [1], [0, 0, 1, 1], [], []>} : vector<64x4xbf16>, vector<4x8xbf16>, vector<64x8xf32> -> vector<64x8xf32>
    %35 = arith.addf %28, %34 : vector<64x8xf32>
    %c2_45 = arith.constant 2 : index
    %c0_46 = arith.constant 0 : index
    %c0_47 = arith.constant 0 : index
    %c1_48 = arith.constant 1 : index
    %c0_49 = arith.constant 0 : index
    %36 = vector.load %arg1[%c2_45, %c0_46, %c0_47, %c1_48, %c0_49] : memref<4x1x9x16x4xbf16, #tpu.memory_space<vmem>>, vector<1x1x8x8x4xbf16>
    %37 = vector.shape_cast %36 : vector<1x1x8x8x4xbf16> to vector<8x8x4xbf16>
    %38 = vector.shape_cast %37 : vector<8x8x4xbf16> to vector<64x4xbf16>
    %c5 = arith.constant 5 : index
    %c0_50 = arith.constant 0 : index
    %c0_51 = arith.constant 0 : index
    %c0_52 = arith.constant 0 : index
    %39 = vector.load %arg2[%c5, %c0_50, %c0_51, %c0_52] : memref<9x1x4x8xbf16, #tpu.memory_space<vmem>>, vector<1x1x4x8xbf16>
    %40 = vector.shape_cast %39 : vector<1x1x4x8xbf16> to vector<4x8xbf16>
    %cst_53 = arith.constant dense<0.000000e+00> : vector<64x8xf32>
    %41 = tpu.matmul %38, %40, %cst_53 {dimension_numbers = #tpu.dot_dimension_numbers<[1], [0], [0], [1], [0, 0, 1, 1], [], []>} : vector<64x4xbf16>, vector<4x8xbf16>, vector<64x8xf32> -> vector<64x8xf32>
    %42 = arith.addf %35, %41 : vector<64x8xf32>
    %c0_54 = arith.constant 0 : index
    %c0_55 = arith.constant 0 : index
    %c1_56 = arith.constant 1 : index
    %c0_57 = arith.constant 0 : index
    %c0_58 = arith.constant 0 : index
    %43 = vector.load %arg1[%c0_54, %c0_55, %c1_56, %c0_57, %c0_58] : memref<4x1x9x16x4xbf16, #tpu.memory_space<vmem>>, vector<1x1x8x8x4xbf16>
    %44 = vector.shape_cast %43 : vector<1x1x8x8x4xbf16> to vector<8x8x4xbf16>
    %45 = vector.shape_cast %44 : vector<8x8x4xbf16> to vector<64x4xbf16>
    %c6 = arith.constant 6 : index
    %c0_59 = arith.constant 0 : index
    %c0_60 = arith.constant 0 : index
    %c0_61 = arith.constant 0 : index
    %46 = vector.load %arg2[%c6, %c0_59, %c0_60, %c0_61] : memref<9x1x4x8xbf16, #tpu.memory_space<vmem>>, vector<1x1x4x8xbf16>
    %47 = vector.shape_cast %46 : vector<1x1x4x8xbf16> to vector<4x8xbf16>
    %cst_62 = arith.constant dense<0.000000e+00> : vector<64x8xf32>
    %48 = tpu.matmul %45, %47, %cst_62 {dimension_numbers = #tpu.dot_dimension_numbers<[1], [0], [0], [1], [0, 0, 1, 1], [], []>} : vector<64x4xbf16>, vector<4x8xbf16>, vector<64x8xf32> -> vector<64x8xf32>
    %49 = arith.addf %42, %48 : vector<64x8xf32>
    %c1_63 = arith.constant 1 : index
    %c0_64 = arith.constant 0 : index
    %c1_65 = arith.constant 1 : index
    %c0_66 = arith.constant 0 : index
    %c0_67 = arith.constant 0 : index
    %50 = vector.load %arg1[%c1_63, %c0_64, %c1_65, %c0_66, %c0_67] : memref<4x1x9x16x4xbf16, #tpu.memory_space<vmem>>, vector<1x1x8x8x4xbf16>
    %51 = vector.shape_cast %50 : vector<1x1x8x8x4xbf16> to vector<8x8x4xbf16>
    %52 = vector.shape_cast %51 : vector<8x8x4xbf16> to vector<64x4xbf16>
    %c7 = arith.constant 7 : index
    %c0_68 = arith.constant 0 : index
    %c0_69 = arith.constant 0 : index
    %c0_70 = arith.constant 0 : index
    %53 = vector.load %arg2[%c7, %c0_68, %c0_69, %c0_70] : memref<9x1x4x8xbf16, #tpu.memory_space<vmem>>, vector<1x1x4x8xbf16>
    %54 = vector.shape_cast %53 : vector<1x1x4x8xbf16> to vector<4x8xbf16>
    %cst_71 = arith.constant dense<0.000000e+00> : vector<64x8xf32>
    %55 = tpu.matmul %52, %54, %cst_71 {dimension_numbers = #tpu.dot_dimension_numbers<[1], [0], [0], [1], [0, 0, 1, 1], [], []>} : vector<64x4xbf16>, vector<4x8xbf16>, vector<64x8xf32> -> vector<64x8xf32>
    %56 = arith.addf %49, %55 : vector<64x8xf32>
    %c0_72 = arith.constant 0 : index
    %c0_73 = arith.constant 0 : index
    %c1_74 = arith.constant 1 : index
    %c1_75 = arith.constant 1 : index
    %c0_76 = arith.constant 0 : index
    %57 = vector.load %arg1[%c0_72, %c0_73, %c1_74, %c1_75, %c0_76] : memref<4x1x9x16x4xbf16, #tpu.memory_space<vmem>>, vector<1x1x8x8x4xbf16>
    %58 = vector.shape_cast %57 : vector<1x1x8x8x4xbf16> to vector<8x8x4xbf16>
    %59 = vector.shape_cast %58 : vector<8x8x4xbf16> to vector<64x4xbf16>
    %c8 = arith.constant 8 : index
    %c0_77 = arith.constant 0 : index
    %c0_78 = arith.constant 0 : index
    %c0_79 = arith.constant 0 : index
    %60 = vector.load %arg2[%c8, %c0_77, %c0_78, %c0_79] : memref<9x1x4x8xbf16, #tpu.memory_space<vmem>>, vector<1x1x4x8xbf16>
    %61 = vector.shape_cast %60 : vector<1x1x4x8xbf16> to vector<4x8xbf16>
    %cst_80 = arith.constant dense<0.000000e+00> : vector<64x8xf32>
    %62 = tpu.matmul %59, %61, %cst_80 {dimension_numbers = #tpu.dot_dimension_numbers<[1], [0], [0], [1], [0, 0, 1, 1], [], []>} : vector<64x4xbf16>, vector<4x8xbf16>, vector<64x8xf32> -> vector<64x8xf32>
    %63 = arith.addf %56, %62 : vector<64x8xf32>
    %64 = vector.shape_cast %63 : vector<64x8xf32> to vector<1x8x8x8xf32>
    %65 = arith.truncf %64 : vector<1x8x8x8xf32> to vector<1x8x8x8xbf16>
    %c0_81 = arith.constant 0 : index
    %c0_82 = arith.constant 0 : index
    %c0_83 = arith.constant 0 : index
    %c0_84 = arith.constant 0 : index
    %66 = vector.load %arg4[%c0_81, %c0_82, %c0_83, %c0_84] : memref<1x8x8x8xbf16, #tpu.memory_space<vmem>>, vector<1x8x8x8xbf16>
    tpu.vector_store %arg4[%c0_81, %c0_82, %c0_83, %c0_84], %65 {strides = array<i32>} : memref<1x8x8x8xbf16, #tpu.memory_space<vmem>>, vector<1x8x8x8xbf16>,
    %cst_85 = arith.constant dense<0.000000e+00> : vector<8xf32>
    %67 = vector.multi_reduction <add>, %63, %cst_85 [0] : vector<64x8xf32> to vector<8xf32>
    %68 = vector.shape_cast %67 : vector<8xf32> to vector<1x8xf32>
    %cst_86 = arith.constant 6.400000e+01 : f32
    %69 = vector.broadcast %cst_86 : f32 to vector<1x8xf32>
    %70 = arith.divf %68, %69 : vector<1x8xf32>
    %71 = vector.broadcast %70 : vector<1x8xf32> to vector<64x8xf32>
    %72 = arith.subf %63, %71 : vector<64x8xf32>
    %cst_87 = arith.constant 6.400000e+01 : f32
    %73 = vector.broadcast %cst_87 : f32 to vector<1x8xf32>
    %74 = arith.mulf %70, %73 : vector<1x8xf32>
    %75 = arith.mulf %72, %72 : vector<64x8xf32>
    %cst_88 = arith.constant dense<0.000000e+00> : vector<8xf32>
    %76 = vector.multi_reduction <add>, %75, %cst_88 [0] : vector<64x8xf32> to vector<8xf32>
    %77 = vector.shape_cast %76 : vector<8xf32> to vector<1x8xf32>
    %78 = tpu.concatenate %74, %77 in 0 : vector<1x8xf32>, vector<1x8xf32> -> vector<2x8xf32>
    %79 = vector.shape_cast %78 : vector<2x8xf32> to vector<1x2x8xf32>
    %c0_89 = arith.constant 0 : index
    %c0_90 = arith.constant 0 : index
    %c0_91 = arith.constant 0 : index
    %80 = vector.load %arg5[%c0_89, %c0_90, %c0_91] : memref<1x2x8xf32, #tpu.memory_space<vmem>>, vector<1x2x8xf32>
    tpu.vector_store %arg5[%c0_89, %c0_90, %c0_91], %79 {strides = array<i32>} : memref<1x2x8xf32, #tpu.memory_space<vmem>>, vector<1x2x8xf32>,
    %cst_92 = arith.constant 0.000000e+00 : f32
    %81 = vector.broadcast %cst_92 : f32 to vector<64x8xf32>
    %c3_93 = arith.constant 3 : index
    %c0_94 = arith.constant 0 : index
    %c0_95 = arith.constant 0 : index
    %c0_96 = arith.constant 0 : index
    %c0_97 = arith.constant 0 : index
    %82 = vector.load %arg1[%c3_93, %c0_94, %c0_95, %c0_96, %c0_97] : memref<4x1x9x16x4xbf16, #tpu.memory_space<vmem>>, vector<1x1x8x8x4xbf16>
    %83 = vector.shape_cast %82 : vector<1x1x8x8x4xbf16> to vector<8x8x4xbf16>
    %84 = vector.shape_cast %83 : vector<8x8x4xbf16> to vector<64x4xbf16>
    %c0_98 = arith.constant 0 : index
    %c0_99 = arith.constant 0 : index
    %c0_100 = arith.constant 0 : index
    %c0_101 = arith.constant 0 : index
    %85 = vector.load %arg3[%c0_98, %c0_99, %c0_100, %c0_101] : memref<1x1x4x8xbf16, #tpu.memory_space<vmem>>, vector<1x1x4x8xbf16>
    %86 = vector.shape_cast %85 : vector<1x1x4x8xbf16> to vector<4x8xbf16>
    %cst_102 = arith.constant dense<0.000000e+00> : vector<64x8xf32>
    %87 = tpu.matmul %84, %86, %cst_102 {dimension_numbers = #tpu.dot_dimension_numbers<[1], [0], [0], [1], [0, 0, 1, 1], [], []>} : vector<64x4xbf16>, vector<4x8xbf16>, vector<64x8xf32> -> vector<64x8xf32>
    %88 = arith.addf %81, %87 : vector<64x8xf32>
    %89 = vector.shape_cast %88 : vector<64x8xf32> to vector<1x8x8x8xf32>
    %90 = arith.truncf %89 : vector<1x8x8x8xf32> to vector<1x8x8x8xbf16>
    %c0_103 = arith.constant 0 : index
    %c0_104 = arith.constant 0 : index
    %c0_105 = arith.constant 0 : index
    %c0_106 = arith.constant 0 : index
    %91 = vector.load %arg6[%c0_103, %c0_104, %c0_105, %c0_106] : memref<1x8x8x8xbf16, #tpu.memory_space<vmem>>, vector<1x8x8x8xbf16>
    tpu.vector_store %arg6[%c0_103, %c0_104, %c0_105, %c0_106], %90 {strides = array<i32>} : memref<1x8x8x8xbf16, #tpu.memory_space<vmem>>, vector<1x8x8x8xbf16>,
    %cst_107 = arith.constant dense<0.000000e+00> : vector<8xf32>
    %92 = vector.multi_reduction <add>, %88, %cst_107 [0] : vector<64x8xf32> to vector<8xf32>
    %93 = vector.shape_cast %92 : vector<8xf32> to vector<1x8xf32>
    %cst_108 = arith.constant 6.400000e+01 : f32
    %94 = vector.broadcast %cst_108 : f32 to vector<1x8xf32>
    %95 = arith.divf %93, %94 : vector<1x8xf32>
    %96 = vector.broadcast %95 : vector<1x8xf32> to vector<64x8xf32>
    %97 = arith.subf %88, %96 : vector<64x8xf32>
    %cst_109 = arith.constant 6.400000e+01 : f32
    %98 = vector.broadcast %cst_109 : f32 to vector<1x8xf32>
    %99 = arith.mulf %95, %98 : vector<1x8xf32>
    %100 = arith.mulf %97, %97 : vector<64x8xf32>
    %cst_110 = arith.constant dense<0.000000e+00> : vector<8xf32>
    %101 = vector.multi_reduction <add>, %100, %cst_110 [0] : vector<64x8xf32> to vector<8xf32>
    %102 = vector.shape_cast %101 : vector<8xf32> to vector<1x8xf32>
    %103 = tpu.concatenate %99, %102 in 0 : vector<1x8xf32>, vector<1x8xf32> -> vector<2x8xf32>
    %104 = vector.shape_cast %103 : vector<2x8xf32> to vector<1x2x8xf32>
    %c0_111 = arith.constant 0 : index
    %c0_112 = arith.constant 0 : index
    %c0_113 = arith.constant 0 : index
    %105 = vector.load %arg7[%c0_111, %c0_112, %c0_113] : memref<1x2x8xf32, #tpu.memory_space<vmem>>, vector<1x2x8xf32>
    tpu.vector_store %arg7[%c0_111, %c0_112, %c0_113], %104 {strides = array<i32>} : memref<1x2x8xf32, #tpu.memory_space<vmem>>, vector<1x2x8xf32>,
    return
  }
  func.func @transform_0(%arg0: i32) -> (i32, i32, i32, i32, i32) {
    %c0_i32 = arith.constant 0 : i32
    %c0_i32_0 = arith.constant 0 : i32
    %c0_i32_1 = arith.constant 0 : i32
    %c0_i32_2 = arith.constant 0 : i32
    %c0_i32_3 = arith.constant 0 : i32
    return %c0_i32, %arg0, %c0_i32_0, %c0_i32_1, %c0_i32_2 : i32, i32, i32, i32, i32
  }
  func.func @transform_1(%arg0: i32) -> (i32, i32, i32, i32) {
    %c0_i32 = arith.constant 0 : i32
    %c0_i32_0 = arith.constant 0 : i32
    %c0_i32_1 = arith.constant 0 : i32
    %c0_i32_2 = arith.constant 0 : i32
    %c0_i32_3 = arith.constant 0 : i32
    return %c0_i32, %c0_i32_0, %c0_i32_1, %c0_i32_2 : i32, i32, i32, i32
  }
  func.func @transform_2(%arg0: i32) -> (i32, i32, i32, i32) {
    %c0_i32 = arith.constant 0 : i32
    %c0_i32_0 = arith.constant 0 : i32
    %c0_i32_1 = arith.constant 0 : i32
    %c0_i32_2 = arith.constant 0 : i32
    %c0_i32_3 = arith.constant 0 : i32
    return %c0_i32, %c0_i32_0, %c0_i32_1, %c0_i32_2 : i32, i32, i32, i32
  }
  func.func @transform_3(%arg0: i32) -> (i32, i32, i32, i32) {
    %c0_i32 = arith.constant 0 : i32
    %c0_i32_0 = arith.constant 0 : i32
    %c0_i32_1 = arith.constant 0 : i32
    %c0_i32_2 = arith.constant 0 : i32
    return %arg0, %c0_i32, %c0_i32_0, %c0_i32_1 : i32, i32, i32, i32
  }
  func.func @transform_4(%arg0: i32) -> (i32, i32, i32) {
    %c0_i32 = arith.constant 0 : i32
    %c0_i32_0 = arith.constant 0 : i32
    %c0_i32_1 = arith.constant 0 : i32
    return %arg0, %c0_i32, %c0_i32_0 : i32, i32, i32
  }
  func.func @transform_5(%arg0: i32) -> (i32, i32, i32, i32) {
    %c0_i32 = arith.constant 0 : i32
    %c0_i32_0 = arith.constant 0 : i32
    %c0_i32_1 = arith.constant 0 : i32
    %c0_i32_2 = arith.constant 0 : i32
    return %arg0, %c0_i32, %c0_i32_0, %c0_i32_1 : i32, i32, i32, i32
  }
  func.func @transform_6(%arg0: i32) -> (i32, i32, i32) {
    %c0_i32 = arith.constant 0 : i32
    %c0_i32_0 = arith.constant 0 : i32
    %c0_i32_1 = arith.constant 0 : i32
    return %arg0, %c0_i32, %c0_i32_0 : i32, i32, i32
  }
}

</mosaic_0001>

<bundles_post_ra>
// kernel: tpu_custom_call.1
= control target key start
LH: loop header
LB: loop body
LE: loop exit
PB: predicated region body
PF: predicated region fallthrough
CT: control target
= control target key end

     0   :  { %12 = vsyncpa [#allocation3], 0  ;;  %s3791_s0 = inlined_call_operand.hbm [shape: bf16[4,2,9,16,4], index: 0, kind: input, shape index: {}]   ;;  %s3792_s1 = inlined_call_operand.hbm [shape: bf16[9,1,4,8], index: 1, kind: input, shape index: {}]   ;;  %s3793_s2 = inlined_call_operand.hbm [shape: bf16[1,1,4,8], index: 2, kind: input, shape index: {}]   ;;  %s3794_s3 = inlined_call_operand.hbm [shape: bf16[2,8,8,8], index: 3, kind: output, shape index: {0}]   ;;  %s3795_s4 = inlined_call_operand.hbm [shape: f32[2,2,8], index: 4, kind: output, shape index: {1}]   ;;  %s3796_s5 = inlined_call_operand.hbm [shape: bf16[2,8,8,8], index: 5, kind: output, shape index: {2}]   ;;  %s3797_s6 = inlined_call_operand.hbm [shape: f32[2,2,8], index: 6, kind: output, shape index: {3}]  }
   0x1   :  { %14 = vsyncpa [#allocation3 + $0x1], 0 }
   0x2   :  { %15 = vsyncpa [#allocation6], 0 }
   0x3   :  { %16 = vsyncpa [#allocation4], 0 }
   0x4   :  { %18 = vsyncpa [#allocation4 + $0x1], 0 }
   0x5   :  { %19 = vsyncpa [#allocation10], 0 }
   0x6   :  { %21 = vsyncpa [#allocation10 + $0x1], 0 }
   0x7   :  { %22 = vsyncpa [#allocation13], 0 }
   0x8   :  { %24 = vsyncpa [#allocation13 + $0x1], 0  ;;  %s3077_s21 = smov 0   ;;  %s3079_s22 = smov 0  }
   0x9   :  { %s3081_s23 = smov 0   ;;  %s3083_s24 = smov 0  }
   0xa LB: > { %s3098_s25 = sadd.s32 4294967295, %s3024_s24   ;;  %s3803_s26 = sadd.s32 4294967294, %s3024_s24   ;;  %s3024_s24 = sphi %s3083_s24, %s3830_s24   ;;  %s3020_s23 = sphi %s3081_s23, %s3834_s23   ;;  %s3016_s22 = sphi %s3079_s22, %s3833_s22   ;;  %s3012_s21 = sphi %s3077_s21, %s3832_s21  }
   0xb   : > { %s3102_s27 = sadd.s32 1, %s3024_s24   ;;  %s37_s28 = sadd.s32 1, %s3020_s23 }
   0xc   : > { %3809 = sst [smem:[#allocation22_spill]] %s3102_s27  ;;  %s34_s29 = ssub.s32 %s3024_s24, %s3102_s27 }
   0xd   : > { %p44_p0 = scmp.ne.s32.totalorder %s3020_s23, %s3016_s22  ;;  %p35_p1 = scmp.eq.s32.totalorder %s34_s29, 0 }
   0xe   : > { %p45_p2 = scmp.eq.s32.totalorder %s3024_s24, 0  ;;  %p50_p3 = scmp.ne.s32.totalorder %s3016_s22, %s3012_s21 }
   0xf   : > { %p3798_p4 = scmp.eq.s32.totalorder %s3098_s25, 0  ;;  %p116_p7 = scmp.eq.s32.totalorder %s3098_s25, 1 }
  0x10   : > { %s3114_s30 = scalar_select %p35_p1, %s3020_s23, %s37_s28  }
  0x11   : > { %p3116_p5 = por %p45_p2, %p44_p0  ;;  %p3122_p6 = por %p3798_p4, %p50_p3 }
  0x12   : > { %3810 = sst [smem:[#allocation23_spill]] %s3114_s30  ;;  %p122_p8 = scmp.eq.s32.totalorder %s3803_s26, 1 }
  0x13   : > { %s3811_s7 = scalar_select %p3116_p5, 1, 0 }
  0x14   : > { %s3812_s8 = scalar_select %p3122_p6, 1, 0 }
  0x15   : > { %p2269_p9 = scmp.ge.s32.totalorder %s3024_s24, 1  ;;  %p207_p10 = scmp.lt.s32.totalorder %s3024_s24, 3 }
  0x16   : > { %p3131_p11 = por %p116_p7, %p44_p0  ;;  %p3135_p12 = por %p122_p8, %p50_p3 }
  0x17   : > { %p3139_p13 = pnand %p2269_p9, %p207_p10  ;;  %s3026_s12 = smov [#allocation5]  }
  0x18   : > { %s3813_s9 = scalar_select %p3131_p11, 1, 0 }
  0x19   : > { %s3814_s10 = scalar_select %p3135_p12, 1, 0 }
  0x1a   : > { %s3815_s11 = scalar_select %p3139_p13, 1, 0 }
  0x1b   : > { %p2709_p1 = pneg %p3139_p13  ;;  %s219_s13 = sshll.u32 %s3026_s12, 4  ;;  %s220_s13 = int_to_ptr.vmem [resolvable:$true] %s219_s13 }
  0x1c   : > { %s3027_s15 = smov [#allocation7]   ;;  %s2806_s19 = scalar_lea.hbm %s3792_s1, 288 }
  0x1d   : > { %p3147_p2 = pnand %p2709_p1, %p3798_p4  ;;  %s233_s16 = sshll.u32 %s3027_s15, 4  ;;  %s3151_s16 = int_to_ptr.vmem [resolvable:$true] %s233_s16 }
  0x1e   : > { %p2807_p0 = scmp.ne.s32.totalorder %s3792_s1, %s2806_s19  ;;  %p2813_p9 = scmp.lt.u32.totalorder %s2806_s19, %s3792_s1 }
  0x1f   : > { %p2808_p3 = pneg %p3147_p2 }
  0x21   : > { %p2809_p7 = pnand %p2808_p3, %p2807_p0 }
  0x23   : > { %p2810_p8 = pneg %p2809_p7 }
  0x25   : > { %p2815_p10 = pnand %p2813_p9, %p2810_p8 }
  0x27   : > { %2818 = shalt.err (!%p2815_p10)
}
  0x28   : > { %s2819_s15 = scalar_lea.vmem %s220_s13, 288  ;;  %p2827_p11 = scmp.lt.s32.totalorder %s220_s13, %s220_s13 }
  0x29   : > { %p2820_p1 = scmp.ne.s32.totalorder %s220_s13, %s2819_s15  ;;  %p2828_p6 = scmp.lt.s32.totalorder %s2819_s15, %s2819_s15 }
  0x2b   : > { %p2822_p4 = pnand %p2820_p1, %p2808_p3  ;;  %p2829_p13 = por %p2828_p6, %p2827_p11 }
  0x2d   : > { %p2823_p12 = pneg %p2822_p4 }
  0x2f   : > { %p2830_p5 = pnand %p2829_p13, %p2823_p12 }
  0x31   : > { %2833 = shalt.err (!%p2830_p5)
}
  0x32   : > { %s3028_s17 = smov 32   ;;  %s3029_s18 = smov 2  }
  0x33   : > { %2712 = dma.hbm_to_vmem [thread:$0]  (!%p3147_p2), %s3792_s1, 288, %s220_s13, [#allocation6], %s3028_s17, %s3028_s17, %s3029_s18  }
  0x34   : > { %s2834_s12 = scalar_lea.hbm %s3793_s2, 32 }
  0x35   : > { %p2835_p4 = scmp.ne.s32.totalorder %s3793_s2, %s2834_s12  ;;  %p2841_p11 = scmp.lt.u32.totalorder %s2834_s12, %s3793_s2 }
  0x37   : > { %p2837_p5 = pnand %p2835_p4, %p2808_p3 }
  0x39   : > { %p2838_p6 = pneg %p2837_p5 }
  0x3b   : > { %p2843_p12 = pnand %p2841_p11, %p2838_p6 }
  0x3d   : > { %2846 = shalt.err (!%p2843_p12)
}
  0x3e   : > { %s2847_s13 = scalar_lea.vmem %s3151_s16, 32  ;;  %p2855_p8 = scmp.lt.s32.totalorder %s3151_s16, %s3151_s16 }
  0x3f   : > { %p2848_p13 = scmp.ne.s32.totalorder %s3151_s16, %s2847_s13  ;;  %p2856_p9 = scmp.lt.s32.totalorder %s2847_s13, %s2847_s13 }
  0x41   : > { %p2850_p0 = pnand %p2848_p13, %p2808_p3  ;;  %p2857_p10 = por %p2856_p9, %p2855_p8 }
  0x43   : > { %p2851_p7 = pneg %p2850_p0 }
  0x45   : > { %p2858_p1 = pnand %p2857_p10, %p2851_p7 }
  0x47   : > { %2861 = shalt.err (!%p2858_p1)
}
  0x48   : > { %2715 = dma.hbm_to_vmem [thread:$0]  (!%p3147_p2), %s3793_s2, 32, %s3151_s16, [#allocation6]  }
  0x49   : > { %p2272_p4 = scmp.ge.s32.totalorder %s3024_s24, 2 }
  0x4b   : > { %240 = sbr.rel (%p2272_p4) target bundleno = 98 (0x62), region = 24 }
  0x52   : > { %s244_s30 = sand.u32 1, %s3020_s23   ;;  %s2682_s17 = smul.u32 1152, %s3024_s24 }
  0x53   : > { %s2681_s14 = smul.u32 288, %s244_s30  ;;  %s3030_s18 = smov 2304  }
  0x54   : > { %p3817_p3 = scmp.ne.s32.totalorder %s3811_s7, 0  ;;  %s254_s28 = scalar_lea.hbm %s3791_s0, %s2682_s17 }
  0x55   : > { %s248_s12 = scalar_lea.vmem [#allocation2], %s2681_s14  ;;  %s3031_s13 = smov 1152  }
  0x56   : > { %2689 = sst [smem:[#allocation15]] (%p3817_p3), %s3030_s18  ;;  %s267_s15 = sshll.u32 %s248_s12, 4  ;;  %s268_s15 = int_to_ptr.vmem [resolvable:$true] %s267_s15 }
  0x57   : > { %s2688_s16 = scalar_select %p3817_p3, [#allocation0], [#allocation16] }
  0x58   : > { %2690 = sst [smem:[#allocation15 + $0x1]] (%p3817_p3), %s3031_s13  ;;  %s3032_s26 = smov 18  }
  0x59   : > { %s259_s29 = sld [smem:[%s2688_s16]]   ;;  %s3033_s27 = smov 64  }
  0x5a   : > { %2691 = sst [smem:[#allocation15 + $0x2]] (%p3817_p3), %s3032_s26  ;;  %s3034_s18 = smov 4  }
  0x5b   : > { %2692 = sst [smem:[#allocation15 + $0x3]] (%p3817_p3), %s3033_s27  ;;  %s245_s14 = scalar_lea.sflag [#allocation3], %s244_s30 }
  0x5c   : > { %2693 = sst [smem:[#allocation15 + $0x4]] (%p3817_p3), %s3033_s27  ;;  %s3035_s19 = smov [#allocation14]  }
  0x5d   : > { %2694 = sst [smem:[#allocation15 + $0x5]] (%p3817_p3), %s3034_s18 }
  0x5f   : > { %s2274_s17 = sshll.u32 %s259_s29, 26 }
  0x60   : > { %s2275_s16 = sadd.s32 134217728, %s2274_s17 }
  0x61   : > { %2695 = dma.general (%p3817_p3), %s254_s28, 4608, %s268_s15, %s245_s14, %s3035_s19, [#allocation15], %s2275_s16, 0  }
  0x62 PF: > { %p3818_p2 = scmp.ne.s32.totalorder %s3815_s11, 0 }
  0x63   : > { %s3227_s20 = sand.u32 (!%p3818_p2), 1, %s3016_s22   ;;  %p3819_p5 = scmp.ne.s32.totalorder (!%p3818_p2), %s3812_s8, 0 }
  0x64   : > { %292 = sbr.rel (%p3818_p2) target bundleno = 538 (0x21a), region = 32  ;;  %s295_s13 = scalar_lea.sflag (!%p3818_p2), [#allocation3], %s3227_s20 }
  0x65   : > { %s2683_s12 = smul.u32 (!%p3818_p2), 288, %s3227_s20 }
  0x67   : > { %s3231_s26 = scalar_lea.vmem (!%p3818_p2), [#allocation2], %s2683_s12 }
  0x6b   : > { %2991 = dma.done.wait (%p3819_p5), %s295_s13, 4608  }
  0x6c   : > { %2993 = vsyncadd (%p3819_p5), %s295_s13, 4294962688  ;;  %p3820_p6 = scmp.eq.s32.totalorder %s3098_s25, 0 }
  0x6e   : > { %2995 = dma.done.wait (%p3820_p6), [#allocation6], 320   ;;  %p3821_p11 = pmov %p3820_p6 }
  0x6f   : > { %vm404_vm0 = vcmask 1041408   ;;  %vm391_vm1 = vcmask 31744   ;;  %v370_v0 = vld [vmem:[#allocation5 + $0x2] sm:$0x3]  ;;  %v935_v1 = vld [vmem:[#allocation5 + $0x8] sm:$0x3] }
  0x70   : > { %2997 = vsyncadd (%p3821_p11), [#allocation6], 4294966976  ;;  %2671 = vmatprep.subr.msk.bf16.mxu1 %vm404_vm0, %v370_v0  ;;  %2675 = vmatprep.subr.msk.bf16.mxu0 %vm404_vm0, %v935_v1  ;;  %v406_v2 = vsel %vm404_vm0, %v370_v0, 0  ;;  %v969_v3 = vsel %vm404_vm0, %v935_v1, 0  ;;  %v2778_v4 = vld [vmem:[%s3231_s26 + $0x48] ss:$8 sps:$4 sm:$0xff]  }
  0x71   : > { %2508 = vmatpush3.bf16.msra.mxu1 %v406_v2  ;;  %2548 = vmatpush3.bf16.msra.mxu0 %v969_v3  ;;  %v2779_v5 = vld [vmem:[%s3231_s26 + $0xd8] ss:$8 sps:$4 sm:$0xff]   ;;  %v2781_v7 = vld [vmem:[%s3231_s26 + $0xe8] ss:$8 sps:$4 sm:$0xff]   ;;  %vm589_vm2 = vsmask.f32 3328 }
  0x72   : > { %2509 = vmatprep.mubr.msk.bf16.mxu1 %vm391_vm1, %v2778_v4  ;;  %v2780_v6 = vld [vmem:[%s3231_s26 + $0x58] ss:$8 sps:$4 sm:$0xff]   ;;  %2549 = vmatprep.mubr.msk.bf16.mxu0 %vm391_vm1, %v2779_v5  ;;  %v1173_v8 = vld [vmem:[#allocation5 + $0xa] sm:$0x3]  ;;  %vm590_vm3 = vsmask.f32 7440 }
  0x73   : > { %v359_v9 = vld [vmem:[#allocation5] sm:$0x3]  ;;  %2676 = vmatprep.subr.msk.bf16.mxu0 %vm404_vm0, %v1173_v8  ;;  %v1199_v10 = vsel %vm404_vm0, %v1173_v8, 0  ;;  %v2782_v12 = vld [vmem:[%s3231_s26 + $0x68] ss:$8 sps:$4 sm:$0xff]   ;;  %vm3278_vm4 = vmor %vm589_vm2, %vm590_vm3  ;;  %s2279_s7 = sshll.u32 %s3227_s20, 5 }
  0x74   : > { %2510 = vmatmul.mubr.msk.bf16.vlgmr.msra.gmra.mrb[0].mxu1 %vm391_vm1, %v2780_v6  ;;  %2550 = vmatmul.mubr.msk.bf16.vlgmr.msra.gmra.mrb[0].mxu0 %vm391_vm1, %v2781_v7  ;;  %v506_v11 = vsel %vm404_vm0, %v359_v9, 0  ;;  %v2783_v13 = vld [vmem:[%s3231_s26 + $0xf8] ss:$8 sps:$4 sm:$0xff]   ;;  %v2785_v15 = vld [vmem:[%s3231_s26 + $0x108] ss:$8 sps:$4 sm:$0xff]   ;;  %vm1750_vm5 = vcmask 60416  }
  0x75   : > { %2558 = vmatpush3.bf16.msra.mxu0 %v1199_v10  ;;  %2672 = vmatprep.subr.msk.bf16.mxu1 %vm404_vm0, %v359_v9  ;;  %v2784_v14 = vld [vmem:[%s3231_s26 + $0x78] ss:$8 sps:$4 sm:$0xff]   ;;  %v2347_v17 = vld [vmem:[%s3231_s26 + $0x90] sm:$0xf]  ;;  %v2348_v18 = vld [vmem:[%s3231_s26 + $0x94] sm:$0x1] }
  0x76   : > { %2518 = vmatpush3.bf16.msra.mxu1 %v506_v11  ;;  %2513 = vmatprep.mubr.msk.bf16.mxu1 %vm391_vm1, %v2782_v12  ;;  %v2786_v16 = vld [vmem:[%s3231_s26] ss:$8 sps:$4 sm:$0xff]   ;;  %v2349_v19 = vld [vmem:[%s3231_s26 + $0x98] sm:$0xf]  ;;  %v2350_v20 = vld [vmem:[%s3231_s26 + $0x9c] sm:$0x1] }
  0x77   : > { %2553 = vmatprep.mubr.msk.bf16.mxu0 %vm391_vm1, %v2783_v13  ;;  %v1061_v21 = vshrl.u32 %v2347_v17, 16  ;;  %v1064_v22 = vshll.u32 %v2347_v17, 16  ;;  %v1070_v23 = vshll.u32 %v2348_v18, 16  ;;  %v1075_v24 = vshrl.u32 %v2349_v19, 16  ;;  %v2787_v33 = vld [vmem:[%s3231_s26 + $0x10] ss:$8 sps:$4 sm:$0xff]  }
  0x78   : > { %v1078_v25 = vshll.u32 %v2349_v19, 16  ;;  %v1084_v26 = vshll.u32 %v2350_v20, 16  ;;  %v2351_v34 = vld [vmem:[%s3231_s26 + $0xa0] sm:$0xf]  ;;  %v2352_v35 = vld [vmem:[%s3231_s26 + $0xa4] sm:$0x1] }
  0x79   : > { %v1063_v27 = vrot.slane %v1061_v21, 4  ;;  %v1066_v28 = vrot.slane %v1064_v22, 5  ;;  %v1072_v29 = vrot.slane %v1070_v23, 5  ;;  %v1077_v30 = vrot.slane %v1075_v24, 4  ;;  %v2353_v37 = vld [vmem:[%s3231_s26 + $0xa8] sm:$0xf] }
  0x7a   : > { %v1080_v31 = vrot.slane %v1078_v25, 5  ;;  %v1086_v32 = vrot.slane %v1084_v26, 5  ;;  %v2354_v38 = vld [vmem:[%s3231_s26 + $0xac] sm:$0x1]  ;;  %v1089_v39 = vshrl.u32 %v2351_v34, 16  ;;  %v1092_v40 = vshll.u32 %v2351_v34, 16 }
  0x7b   : > { %v1067_v36 = vor.u32 %v1066_v28, %v1063_v27  ;;  %v1098_v43 = vshll.u32 %v2352_v35, 16  ;;  %v1103_v44 = vshrl.u32 %v2353_v37, 16  ;;  %v1106_v45 = vshll.u32 %v2353_v37, 16  ;;  %v1284_v46 = vld [vmem:[#allocation5 + $0xc] sm:$0x3]  ;;  %s3446_s8 = scalar_lea.vmem [#allocation8], %s2279_s7 }
  0x7c   : > { %2514 = vmatmul.mubr.msk.bf16.gmra.mrb[4].mxu1 %vm391_vm1, %v2784_v14  ;;  %2554 = vmatmul.mubr.msk.bf16.gmra.mrb[4].mxu0 %vm391_vm1, %v2785_v15  ;;  %v1081_v42 = vor.u32 %v1080_v31, %v1077_v30  ;;  %v1091_v48 = vrot.slane %v1089_v39, 4  ;;  %v1094_v49 = vrot.slane %v1092_v40, 5  ;;  %v1112_v50 = vshll.u32 %v2354_v38, 16  ;;  %v705_v51 = vld [vmem:[#allocation5 + $0x4] sm:$0x3]  ;;  %s3476_s11 = scalar_lea.vmem [#allocation11], %s2279_s7 }
  0x7d   : > { %2519 = vmatprep.mubr.msk.bf16.mxu1 %vm391_vm1, %v2786_v16  ;;  %v1068_v47 = vrot.slane %v1067_v36, 4  ;;  %2677 = vmatprep.subr.msk.bf16.mxu0 %vm404_vm0, %v1284_v46  ;;  %v1105_v53 = vrot.slane %v1103_v44, 4  ;;  %v1108_v54 = vrot.slane %v1106_v45, 5  ;;  %v1100_v57 = vrot.slane %v1098_v43, 5  ;;  %v2788_v59 = vld [vmem:[%s3231_s26 + $0x20] ss:$8 sps:$4 sm:$0xff]  }
  0x7e   : > { %v1082_v52 = vrot.slane %v1081_v42, 4  ;;  %2673 = vmatprep.subr.msk.bf16.mxu1 %vm404_vm0, %v705_v51  ;;  %v1095_v56 = vor.u32 %v1094_v49, %v1091_v48  ;;  %v1114_v58 = vrot.slane %v1112_v50, 5  ;;  %v1318_v62 = vsel %vm404_vm0, %v1284_v46, 0  ;;  %v2355_v0 = vld [vmem:[%s3231_s26 + $0xb0] sm:$0xf]  ;;  %s2455_s30 = sshll.u32 %s3098_s25, 9 }
  0x7f   : > { %v1073_v55 = vsel %vm3278_vm4, %v1068_v47, %v1072_v29  ;;  %v1109_v61 = vor.u32 %v1108_v54, %v1105_v53  ;;  %v731_v63 = vsel %vm404_vm0, %v705_v51, 0  ;;  %v2356_v1 = vld [vmem:[%s3231_s26 + $0xb4] sm:$0x1]  ;;  %v2357_v4 = vld [vmem:[%s3231_s26 + $0xb8] sm:$0xf]  ;;  %v1117_v6 = vshrl.u32 %v2355_v0, 16  ;;  %s3558_s27 = scalar_lea.hbm %s3794_s3, %s2455_s30 }
  0x80   : > { %v1087_v60 = vsel %vm3278_vm4, %v1082_v52, %v1086_v32  ;;  %v1096_v3 = vrot.slane %v1095_v56, 4  ;;  %v2358_v5 = vld [vmem:[%s3231_s26 + $0xbc] sm:$0x1]  ;;  %v1120_v8 = vshll.u32 %v2355_v0, 16  ;;  %v1126_v9 = vshll.u32 %v2356_v1, 16  ;;  %s2041_s28 = sshll.u32 %s3446_s8, 4  ;;  %s3560_s28 = int_to_ptr.vmem [resolvable:$true] %s2041_s28 }
  0x81   : > { %v2363_v2 = vcombine.low %v1073_v55, %v1087_v60  ;;  %v1110_v7 = vrot.slane %v1109_v61, 4  ;;  %v1131_v10 = vshrl.u32 %v2357_v4, 16  ;;  %v1119_v12 = vrot.slane %v1117_v6, 4  ;;  %v2789_v19 = vld [vmem:[%s3231_s26 + $0x30] ss:$8 sps:$4 sm:$0xff]   ;;  %s2013_s18 = scalar_lea.sflag [#allocation4], %s3227_s20 }
  0x82   : > { %v1101_v11 = vsel %vm3278_vm4, %v1096_v3, %v1100_v57  ;;  %v1134_v13 = vshll.u32 %v2357_v4, 16  ;;  %v1140_v14 = vshll.u32 %v2358_v5, 16  ;;  %v1122_v16 = vrot.slane %v1120_v8, 5  ;;  %v2359_v23 = vld [vmem:[%s3231_s26 + $0xc0] sm:$0xf]  ;;  %s2862_s17 = scalar_lea.vmem %s3560_s28, 512 }
  0x83   : > { %2559 = vmatprep.mubr.msk.bf16.mxu0 %vm391_vm1, %v2363_v2  ;;  %v1115_v15 = vsel %vm3278_vm4, %v1110_v7, %v1114_v58  ;;  %v1128_v17 = vrot.slane %v1126_v9, 5  ;;  %v1133_v18 = vrot.slane %v1131_v10, 4  ;;  %v2360_v24 = vld [vmem:[%s3231_s26 + $0xc4] sm:$0x1]  ;;  %v2361_v26 = vld [vmem:[%s3231_s26 + $0xc8] sm:$0xf]  ;;  %p2863_p12 = scmp.ne.s32.totalorder %s3560_s28, %s2862_s17 }
  0x84   : > { %2520 = vmatmul.mubr.msk.bf16.vlgmr.msra.gmra.mrb[0].mxu1 %vm391_vm1, %v2787_v33  ;;  %v2364_v20 = vcombine.low %v1101_v11, %v1115_v15  ;;  %v1136_v21 = vrot.slane %v1134_v13, 5  ;;  %v1142_v22 = vrot.slane %v1140_v14, 5  ;;  %v1123_v25 = vor.u32 %v1122_v16, %v1119_v12  ;;  %v2362_v27 = vld [vmem:[%s3231_s26 + $0xcc] sm:$0x1]  ;;  %v573_v34 = vld [vmem:[%s3231_s26] sm:$0xf] }
  0x85   : > { %2528 = vmatpush3.bf16.msra.mxu1 %v731_v63  ;;  %2523 = vmatprep.mubr.msk.bf16.mxu1 %vm391_vm1, %v2788_v59  ;;  %v1145_v28 = vshrl.u32 %v2359_v23, 16  ;;  %v1148_v29 = vshll.u32 %v2359_v23, 16  ;;  %v1154_v31 = vshll.u32 %v2360_v24, 16  ;;  %v1159_v32 = vshrl.u32 %v2361_v26, 16  ;;  %v574_v39 = vld [vmem:[%s3231_s26 + $0x4] sm:$0x1] }
  0x86   : > { %2560 = vmatmul.mubr.msk.bf16.vlgmr.msra.gmra.mrb[0].mxu0 %vm391_vm1, %v2364_v20  ;;  %v1137_v30 = vor.u32 %v1136_v21, %v1133_v18  ;;  %v1162_v33 = vshll.u32 %v2361_v26, 16  ;;  %v1124_v35 = vrot.slane %v1123_v25, 4  ;;  %v1168_v38 = vshll.u32 %v2362_v27, 16  ;;  %v575_v45 = vld [vmem:[%s3231_s26 + $0x8] sm:$0xf]  ;;  %p3824_p13 = scmp.ne.s32.totalorder %s3813_s9, 0 }
  0x87   : > { %2568 = vmatpush3.bf16.msra.mxu0 %v1318_v62  ;;  %v1147_v36 = vrot.slane %v1145_v28, 4  ;;  %v1150_v37 = vrot.slane %v1148_v29, 5  ;;  %v1156_v42 = vrot.slane %v1154_v31, 5  ;;  %v1161_v43 = vrot.slane %v1159_v32, 4  ;;  %v576_v52 = vld [vmem:[%s3231_s26 + $0xc] sm:$0x1] }
  0x88   : > { %v1138_v40 = vrot.slane %v1137_v30, 4  ;;  %v1164_v44 = vrot.slane %v1162_v33, 5  ;;  %v1129_v46 = vsel %vm3278_vm4, %v1124_v35, %v1128_v17  ;;  %v1170_v48 = vrot.slane %v1168_v38, 5  ;;  %v577_v59 = vld [vmem:[%s3231_s26 + $0x10] sm:$0xf]  ;;  %p2864_p0 = pnand %p2863_p12, %p3824_p13  ;;  %s3036_s16 = smov [#allocation8]  }
  0x89   : > { %v1151_v47 = vor.u32 %v1150_v37, %v1147_v36  ;;  %v593_v49 = vshrl.u32 %v573_v34, 16  ;;  %v596_v53 = vshll.u32 %v573_v34, 16  ;;  %v602_v54 = vshll.u32 %v574_v39, 16  ;;  %v2790_v0 = vld [vmem:[%s3231_s26 + $0x8] ss:$8 sps:$4 sm:$0xff]   ;;  %s2866_s14 = sshll.u32 %s3036_s16, 4  ;;  %s2867_s14 = int_to_ptr.vmem [resolvable:$false] %s2866_s14 }
  0x8a   : > { %v1143_v50 = vsel %vm3278_vm4, %v1138_v40, %v1142_v22  ;;  %v1165_v51 = vor.u32 %v1164_v44, %v1161_v43  ;;  %v607_v58 = vshrl.u32 %v575_v45, 16  ;;  %v610_v63 = vshll.u32 %v575_v45, 16  ;;  %v578_v1 = vld [vmem:[%s3231_s26 + $0x14] sm:$0x1]  ;;  %v579_v5 = vld [vmem:[%s3231_s26 + $0x18] sm:$0xf]  ;;  %p2865_p7 = pneg %p2864_p0  ;;  %p2869_p8 = scmp.lt.s32.totalorder %s3560_s28, %s2867_s14 }
  0x8b   : > { %v2365_v55 = vcombine.low %v1129_v46, %v1143_v50  ;;  %v1152_v56 = vrot.slane %v1151_v47, 4  ;;  %v595_v57 = vrot.slane %v593_v49, 4  ;;  %v598_v61 = vrot.slane %v596_v53, 5  ;;  %v580_v6 = vld [vmem:[%s3231_s26 + $0x1c] sm:$0x1]  ;;  %s2868_s19 = scalar_lea.vmem %s2867_s14, 1024 }
  0x8c   : > { %2524 = vmatmul.mubr.msk.bf16.gmra.mrb[4].mxu1 %vm391_vm1, %v2789_v19  ;;  %v1166_v60 = vrot.slane %v1165_v51, 4  ;;  %v604_v62 = vrot.slane %v602_v54, 5  ;;  %v609_v3 = vrot.slane %v607_v58, 4  ;;  %v616_v4 = vshll.u32 %v576_v52, 16  ;;  %v1403_v19 = vld [vmem:[#allocation5 + $0xe] sm:$0x3]  ;;  %p2870_p9 = scmp.lt.s32.totalorder %s2868_s19, %s2862_s17 }
  0x8d   : > { %2563 = vmatprep.mubr.msk.bf16.mxu0 %vm391_vm1, %v2365_v55  ;;  %v1157_v2 = vsel %vm3278_vm4, %v1152_v56, %v1156_v42  ;;  %v599_v8 = vor.u32 %v598_v61, %v595_v57  ;;  %v612_v9 = vrot.slane %v610_v63, 5  ;;  %v621_v10 = vshrl.u32 %v577_v59, 16  ;;  %2678 = vmatprep.subr.msk.bf16.mxu0 %vm404_vm0, %v1403_v19  ;;  %v816_v24 = vld [vmem:[#allocation5 + $0x6] sm:$0x3]  ;;  %v581_v29 = vld [vmem:[%s3231_s26 + $0x20] sm:$0xf] }
  0x8e   : > { %v1171_v7 = vsel %vm3278_vm4, %v1166_v60, %v1170_v48  ;;  %v618_v12 = vrot.slane %v616_v4, 5  ;;  %v624_v13 = vshll.u32 %v577_v59, 16  ;;  %v630_v14 = vshll.u32 %v578_v1, 16  ;;  %2674 = vmatprep.subr.msk.bf16.mxu1 %vm404_vm0, %v816_v24  ;;  %v2791_v33 = vld [vmem:[%s3231_s26 + $0x18] ss:$8 sps:$4 sm:$0xff]   ;;  %p2871_p10 = por %p2870_p9, %p2869_p8 }
  0x8f   : > { %v2366_v11 = vcombine.low %v1157_v2, %v1171_v7  ;;  %v600_v15 = vrot.slane %v599_v8, 4  ;;  %v613_v16 = vor.u32 %v612_v9, %v609_v3  ;;  %v623_v17 = vrot.slane %v621_v10, 4  ;;  %v582_v35 = vld [vmem:[%s3231_s26 + $0x24] sm:$0x1]  ;;  %v583_v37 = vld [vmem:[%s3231_s26 + $0x28] sm:$0xf] }
  0x90   : > { %v635_v18 = vshrl.u32 %v579_v5, 16  ;;  %v626_v20 = vrot.slane %v624_v13, 5  ;;  %v632_v21 = vrot.slane %v630_v14, 5  ;;  %v638_v22 = vshll.u32 %v579_v5, 16  ;;  %v584_v38 = vld [vmem:[%s3231_s26 + $0x2c] sm:$0x1]  ;;  %p2872_p1 = pnand %p2871_p10, %p2865_p7 }
  0x91   : > { %2564 = vmatmul.mubr.msk.bf16.gmra.mrb[4].mxu0 %vm391_vm1, %v2366_v11  ;;  %v644_v23 = vshll.u32 %v580_v6, 16  ;;  %v605_v25 = vsel %vm3278_vm4, %v600_v15, %v604_v62  ;;  %v614_v26 = vrot.slane %v613_v16, 4  ;;  %v1437_v28 = vsel %vm404_vm0, %v1403_v19, 0  ;;  %v2792_v50 = vld [vmem:[%s3231_s26 + $0x28] ss:$8 sps:$4 sm:$0xff]  }
  0x92   : > { %2569 = vmatprep.mubr.msk.bf16.mxu0 %vm391_vm1, %v2790_v0  ;;  %v637_v27 = vrot.slane %v635_v18, 4  ;;  %v627_v30 = vor.u32 %v626_v20, %v623_v17  ;;  %v640_v31 = vrot.slane %v638_v22, 5  ;;  %v850_v34 = vsel %vm404_vm0, %v816_v24, 0  ;;  %v585_v55 = vld [vmem:[%s3231_s26 + $0x30] sm:$0xf] }
  0x93   : > { %v646_v32 = vrot.slane %v644_v23, 5  ;;  %v619_v36 = vsel %vm3278_vm4, %v614_v26, %v618_v12  ;;  %v649_v39 = vshrl.u32 %v581_v29, 16  ;;  %v652_v40 = vshll.u32 %v581_v29, 16  ;;  %v586_v59 = vld [vmem:[%s3231_s26 + $0x34] sm:$0x1] }
  0x94   : > { %v2307_v42 = vcombine.low %v605_v25, %v619_v36  ;;  %v628_v43 = vrot.slane %v627_v30, 4  ;;  %v641_v44 = vor.u32 %v640_v31, %v637_v27  ;;  %v658_v45 = vshll.u32 %v582_v35, 16  ;;  %v587_v60 = vld [vmem:[%s3231_s26 + $0x38] sm:$0xf]  ;;  %v588_v63 = vld [vmem:[%s3231_s26 + $0x3c] sm:$0x1] }
  0x95   : > { %v651_v46 = vrot.slane %v649_v39, 4  ;;  %v654_v47 = vrot.slane %v652_v40, 5  ;;  %v663_v48 = vshrl.u32 %v583_v37, 16  ;;  %v666_v49 = vshll.u32 %v583_v37, 16  ;;  %v2793_v13 = vld [vmem:[%s3231_s26 + $0x38] ss:$8 sps:$4 sm:$0xff]  }
  0x96   : > { %2529 = vmatprep.mubr.msk.bf16.mxu1 %vm391_vm1, %v2307_v42  ;;  %v633_v51 = vsel %vm3278_vm4, %v628_v43, %v632_v21  ;;  %v642_v52 = vrot.slane %v641_v44, 4  ;;  %v660_v53 = vrot.slane %v658_v45, 5  ;;  %v672_v54 = vshll.u32 %v584_v38, 16  ;;  %v2795_v23 = vld [vmem:[%s3231_s26 + $0x50] ss:$8 sps:$4 sm:$0xff]  }
  0x97   : > { %v655_v56 = vor.u32 %v654_v47, %v651_v46  ;;  %v665_v57 = vrot.slane %v663_v48, 4  ;;  %v668_v58 = vrot.slane %v666_v49, 5  ;;  %v677_v0 = vshrl.u32 %v585_v55, 16  ;;  %v1641_v26 = vld [vmem:[#allocation5 + $0x10] sm:$0x3] }
  0x98   : > { %v647_v61 = vsel %vm3278_vm4, %v642_v52, %v646_v32  ;;  %v674_v62 = vrot.slane %v672_v54, 5  ;;  %v680_v1 = vshll.u32 %v585_v55, 16  ;;  %v686_v5 = vshll.u32 %v586_v59, 16  ;;  %v1833_v27 = vld [vmem:[#allocation7] sm:$0x3] }
  0x99   : > { %2570 = vmatmul.mubr.msk.bf16.vlgmr.msra.gmra.mrb[0].mxu0 %vm391_vm1, %v2791_v33  ;;  %v2308_v2 = vcombine.low %v633_v51, %v647_v61  ;;  %v656_v3 = vrot.slane %v655_v56, 4  ;;  %v669_v4 = vor.u32 %v668_v58, %v665_v57  ;;  %v679_v6 = vrot.slane %v677_v0, 4  ;;  %v2794_v29 = vld [vmem:[%s3231_s26 + $0x90] ss:$8 sps:$4 sm:$0xff]   ;;  %v2797_v31 = vld [vmem:[%s3231_s26 + $0x60] ss:$8 sps:$4 sm:$0xff]  }
  0x9a   : > { %2578 = vmatpush3.bf16.msra.mxu0 %v1437_v28  ;;  %2573 = vmatprep.mubr.msk.bf16.mxu0 %vm391_vm1, %v2792_v50  ;;  %v682_v7 = vrot.slane %v680_v1, 5  ;;  %v691_v8 = vshrl.u32 %v587_v60, 16  ;;  %v694_v9 = vshll.u32 %v587_v60, 16  ;;  %v700_v12 = vshll.u32 %v588_v63, 16  ;;  %v2403_v35 = vld [vmem:[%s3231_s26 + $0x8] sm:$0xf] }
  0x9b   : > { %2530 = vmatmul.mubr.msk.bf16.vlgmr.msra.gmra.mrb[0].mxu1 %vm391_vm1, %v2308_v2  ;;  %v661_v10 = vsel %vm3278_vm4, %v656_v3, %v660_v53  ;;  %v670_v11 = vrot.slane %v669_v4, 4  ;;  %v688_v15 = vrot.slane %v686_v5, 5  ;;  %2679 = vmatprep.subr.msk.bf16.mxu0 %vm404_vm0, %v1641_v26  ;;  %v1667_v32 = vsel %vm404_vm0, %v1641_v26, 0  ;;  %v2404_v36 = vld [vmem:[%s3231_s26 + $0xc] sm:$0x1] }
  0x9c   : > { %2538 = vmatpush3.bf16.msra.mxu1 %v850_v34  ;;  %v683_v14 = vor.u32 %v682_v7, %v679_v6  ;;  %v693_v16 = vrot.slane %v691_v8, 4  ;;  %v696_v17 = vrot.slane %v694_v9, 5  ;;  %v702_v22 = vrot.slane %v700_v12, 5  ;;  %v2799_v34 = vld [vmem:[%s3231_s26 + $0x70] ss:$8 sps:$4 sm:$0xff]  }
  0x9d   : > { %v675_v18 = vsel %vm3278_vm4, %v670_v11, %v674_v62  ;;  %2680 = vmatprep.subr.msk.bf16.mxu1 %vm404_vm0, %v1833_v27  ;;  %v1867_v33 = vsel %vm404_vm0, %v1833_v27, 0  ;;  %v2405_v37 = vld [vmem:[%s3231_s26 + $0x10] sm:$0xf]  ;;  %v2796_v38 = vld [vmem:[%s3231_s26 + $0xa0] ss:$8 sps:$4 sm:$0xff]   ;;  %v1529_v40 = vshrl.u32 %v2403_v35, 16 }
  0x9e   : > { %v2309_v19 = vcombine.low %v661_v10, %v675_v18  ;;  %v684_v20 = vrot.slane %v683_v14, 4  ;;  %v697_v21 = vor.u32 %v696_v17, %v693_v16  ;;  %v2406_v39 = vld [vmem:[%s3231_s26 + $0x14] sm:$0x1]  ;;  %v1532_v42 = vshll.u32 %v2403_v35, 16  ;;  %v2798_v47 = vld [vmem:[%s3231_s26 + $0xb0] ss:$8 sps:$4 sm:$0xff]  }
  0x9f   : > { %v1538_v43 = vshll.u32 %v2404_v36, 16  ;;  %v1543_v44 = vshrl.u32 %v2405_v37, 16  ;;  %v1546_v45 = vshll.u32 %v2405_v37, 16  ;;  %v1552_v46 = vshll.u32 %v2406_v39, 16  ;;  %v2801_v52 = vld [vmem:[%s3231_s26 + $0x80] ss:$8 sps:$4 sm:$0xff]  }
  0xa0   : > { %2533 = vmatprep.mubr.msk.bf16.mxu1 %vm391_vm1, %v2309_v19  ;;  %v689_v24 = vsel %vm3278_vm4, %v684_v20, %v688_v15  ;;  %v698_v25 = vrot.slane %v697_v21, 4  ;;  %v1531_v48 = vrot.slane %v1529_v40, 4  ;;  %v1534_v49 = vrot.slane %v1532_v42, 5  ;;  %v2407_v55 = vld [vmem:[%s3231_s26 + $0x18] sm:$0xf] }
  0xa1   : > { %2574 = vmatmul.mubr.msk.bf16.gmra.mrb[4].mxu0 %vm391_vm1, %v2793_v13  ;;  %v1540_v50 = vrot.slane %v1538_v43, 5  ;;  %v1545_v51 = vrot.slane %v1543_v44, 4  ;;  %v1548_v53 = vrot.slane %v1546_v45, 5  ;;  %v1554_v54 = vrot.slane %v1552_v46, 5  ;;  %v2408_v56 = vld [vmem:[%s3231_s26 + $0x1c] sm:$0x1] }
  0xa2   : > { %2579 = vmatprep.mubr.msk.bf16.mxu0 %vm391_vm1, %v2795_v23  ;;  %v703_v28 = vsel %vm3278_vm4, %v698_v25, %v702_v22  ;;  %v1535_v57 = vor.u32 %v1534_v49, %v1531_v48  ;;  %v2409_v58 = vld [vmem:[%s3231_s26 + $0x20] sm:$0xf]  ;;  %v2410_v59 = vld [vmem:[%s3231_s26 + $0x24] sm:$0x1]  ;;  %v1557_v60 = vshrl.u32 %v2407_v55, 16  ;;  %v1560_v61 = vshll.u32 %v2407_v55, 16 }
  0xa3   : > { %v2310_v30 = vcombine.low %v689_v24, %v703_v28  ;;  %v1549_v62 = vor.u32 %v1548_v53, %v1545_v51  ;;  %v1566_v63 = vshll.u32 %v2408_v56, 16  ;;  %v1571_v0 = vshrl.u32 %v2409_v58, 16  ;;  %v2800_v9 = vld [vmem:[%s3231_s26 + $0xc0] ss:$8 sps:$4 sm:$0xff]   ;;  %v2412_v15 = vld [vmem:[%s3231_s26 + $0x2c] sm:$0x1] }
  0xa4   : > { %v1574_v1 = vshll.u32 %v2409_v58, 16  ;;  %v1536_v2 = vrot.slane %v1535_v57, 4  ;;  %v1559_v3 = vrot.slane %v1557_v60, 4  ;;  %v1562_v4 = vrot.slane %v1560_v61, 5  ;;  %v2411_v14 = vld [vmem:[%s3231_s26 + $0x28] sm:$0xf] }
  0xa5   : > { %2534 = vmatmul.mubr.msk.bf16.gmra.mrb[4].mxu1 %vm391_vm1, %v2310_v30  ;;  %v1580_v5 = vshll.u32 %v2410_v59, 16  ;;  %v1550_v6 = vrot.slane %v1549_v62, 4  ;;  %v1573_v7 = vrot.slane %v1571_v0, 4  ;;  %v1568_v12 = vrot.slane %v1566_v63, 5  ;;  %v2802_v17 = vld [vmem:[%s3231_s26 + $0xd8] ss:$8 sps:$4 sm:$0xff]  }
  0xa6   : > { %2539 = vmatprep.mubr.msk.bf16.mxu1 %vm391_vm1, %v2794_v29  ;;  %v1576_v8 = vrot.slane %v1574_v1, 5  ;;  %v1541_v10 = vsel %vm3278_vm4, %v1536_v2, %v1540_v50  ;;  %v1563_v11 = vor.u32 %v1562_v4, %v1559_v3  ;;  %v2413_v19 = vld [vmem:[%s3231_s26 + $0x30] sm:$0xf]  ;;  %v2414_v20 = vld [vmem:[%s3231_s26 + $0x34] sm:$0x1]  ;;  %v1585_v21 = vshrl.u32 %v2411_v14, 16 }
  0xa7   : > { %v1582_v13 = vrot.slane %v1580_v5, 5  ;;  %v1555_v16 = vsel %vm3278_vm4, %v1550_v6, %v1554_v54  ;;  %v1588_v22 = vshll.u32 %v2411_v14, 16  ;;  %v1594_v25 = vshll.u32 %v2412_v15, 16  ;;  %v2416_v39 = vld [vmem:[%s3231_s26 + $0x3c] sm:$0x1] }
  0xa8   : > { %v1577_v18 = vor.u32 %v1576_v8, %v1573_v7  ;;  %v2419_v23 = vcombine.low %v1541_v10, %v1555_v16  ;;  %v1564_v24 = vrot.slane %v1563_v11, 4  ;;  %v1599_v26 = vshrl.u32 %v2413_v19, 16  ;;  %v2417_v43 = vld [vmem:[%s3231_s26 + $0x40] sm:$0xf]  ;;  %v2418_v44 = vld [vmem:[%s3231_s26 + $0x44] sm:$0x1] }
  0xa9   : > { %2580 = vmatmul.mubr.msk.bf16.vlgmr.msra.gmra.mrb[0].mxu0 %vm391_vm1, %v2797_v31  ;;  %v1587_v28 = vrot.slane %v1585_v21, 4  ;;  %v1590_v29 = vrot.slane %v1588_v22, 5  ;;  %v1602_v30 = vshll.u32 %v2413_v19, 16  ;;  %v1596_v36 = vrot.slane %v1594_v25, 5  ;;  %v2803_v57 = vld [vmem:[%s3231_s26 + $0xe8] ss:$8 sps:$4 sm:$0xff]  }
  0xaa   : > { %2588 = vmatpush3.bf16.msra.mxu0 %v1667_v32  ;;  %2583 = vmatprep.mubr.msk.bf16.mxu0 %vm391_vm1, %v2799_v34  ;;  %v1578_v27 = vrot.slane %v1577_v18, 4  ;;  %v1569_v31 = vsel %vm3278_vm4, %v1564_v24, %v1568_v12  ;;  %v1601_v32 = vrot.slane %v1599_v26, 4  ;;  %v1622_v49 = vshll.u32 %v2416_v39, 16  ;;  %v2804_v61 = vld [vmem:[%s3231_s26 + $0xf8] ss:$8 sps:$4 sm:$0xff]  }
  0xab   : > { %v1591_v35 = vor.u32 %v1590_v29, %v1587_v28  ;;  %v1604_v37 = vrot.slane %v1602_v30, 5  ;;  %v1627_v51 = vshrl.u32 %v2417_v43, 16  ;;  %v1636_v53 = vshll.u32 %v2418_v44, 16  ;;  %v2805_v8 = vld [vmem:[%s3231_s26 + $0x108] ss:$8 sps:$4 sm:$0xff]  }
  0xac   : > { %v1583_v34 = vsel %vm3278_vm4, %v1578_v27, %v1582_v13  ;;  %v1624_v63 = vrot.slane %v1622_v49, 5  ;;  %vm1759_vm6 = vcmask 64512  }
  0xad   : > { %2540 = vmatmul.mubr.msk.bf16.vlgmr.msra.gmra.mrb[0].mxu1 %vm391_vm1, %v2796_v38  ;;  %v2415_v38 = vld [vmem:[%s3231_s26 + $0x38] sm:$0xf]  ;;  %v2420_v40 = vcombine.low %v1569_v31, %v1583_v34  ;;  %v1592_v46 = vrot.slane %v1591_v35, 4  ;;  %v1629_v58 = vrot.slane %v1627_v51, 4  ;;  %v1638_v2 = vrot.slane %v1636_v53, 5 }
  0xae   : > { %2598 = vmatpush3.bf16.msra.mxu1 %v1867_v33  ;;  %2543 = vmatprep.mubr.msk.bf16.mxu1 %vm391_vm1, %v2798_v47  ;;  %v1608_v33 = vshll.u32 %v2414_v20, 16  ;;  %v1613_v45 = vshrl.u32 %v2415_v38, 16  ;;  %v1605_v47 = vor.u32 %v1604_v37, %v1601_v32  ;;  %v1616_v48 = vshll.u32 %v2415_v38, 16 }
  0xaf   : > { %v1597_v54 = vsel %vm3278_vm4, %v1592_v46, %v1596_v36 }
  0xb0   : > { %v1610_v42 = vrot.slane %v1608_v33, 5  ;;  %v1615_v50 = vrot.slane %v1613_v45, 4  ;;  %v1606_v55 = vrot.slane %v1605_v47, 4  ;;  %v1618_v56 = vrot.slane %v1616_v48, 5 }
  0xb1   : > { %2584 = vmatmul.mubr.msk.bf16.gmra.mrb[4].mxu0 %vm391_vm1, %v2801_v52  ;;  %v1630_v52 = vshll.u32 %v2417_v43, 16 }
  0xb2   : > { %2589 = vmatprep.mubr.msk.bf16.mxu0 %vm391_vm1, %v2419_v23  ;;  %v1611_v60 = vsel %vm3278_vm4, %v1606_v55, %v1610_v42  ;;  %v1619_v62 = vor.u32 %v1618_v56, %v1615_v50 }
  0xb3   : > { %v1632_v59 = vrot.slane %v1630_v52, 5  ;;  %v2421_v0 = vcombine.low %v1597_v54, %v1611_v60 }
  0xb4   : > { %v1620_v3 = vrot.slane %v1619_v62, 4 }
  0xb5   : > { %2544 = vmatmul.mubr.msk.bf16.gmra.mrb[4].mxu1 %vm391_vm1, %v2800_v9  ;;  %v1633_v1 = vor.u32 %v1632_v59, %v1629_v58 }
  0xb6   : > { %2599 = vmatprep.mubr.msk.bf16.mxu1 %vm391_vm1, %v2802_v17  ;;  %v1625_v5 = vsel %vm3278_vm4, %v1620_v3, %v1624_v63 }
  0xb7   : > { %v1634_v4 = vrot.slane %v1633_v1, 4 }
  0xb9   : > { %2590 = vmatmul.mubr.msk.bf16.vlgmr.msra.gmra.mrb[0].mxu0 %vm391_vm1, %v2420_v40  ;;  %v1639_v6 = vsel %vm3278_vm4, %v1634_v4, %v1638_v2 }
  0xba   : > { %2593 = vmatprep.mubr.msk.bf16.mxu0 %vm391_vm1, %v2421_v0  ;;  %v2422_v7 = vcombine.low %v1625_v5, %v1639_v6 }
  0xbd   : > { %2600 = vmatmul.mubr.msk.bf16.vlgmr.msra.gmra.mrb[8].mxu1 %vm391_vm1, %v2803_v57 }
  0xbe   : > { %2603 = vmatprep.mubr.msk.bf16.mxu1 %vm391_vm1, %v2804_v61 }
  0xc1   : > { %2594 = vmatmul.mubr.msk.bf16.gmra.mrb[4].mxu0 %vm391_vm1, %v2422_v7 }
  0xc5   : > { %2604 = vmatmul.mubr.msk.bf16.gmra.mrb[12].mxu1 %vm391_vm1, %v2805_v8 }
 0x180   : > { %v2541_v9 = vpop.f32.mrb[0].mxu1 }
 0x181   : > { %v886_v10 = vpop.f32.mrb[1].mxu1 }
 0x182   : > { %v2542_v11 = vpop.f32.mrb[2].mxu1 }
 0x183   : > { %v889_v12 = vpop.f32.mrb[3].mxu1 }
 0x188   : > { %v2545_v13 = vpop.f32.mrb[4].mxu1 }
 0x189   : > { %v902_v14 = vpop.f32.mrb[5].mxu1 }
 0x18a   : > { %v2546_v15 = vpop.f32.mrb[6].mxu1 }
 0x18b   : > { %v3432_v16 = vpop.f32.mrb[7].mxu1 }
 0x18c   : > { %v2591_v17 = vpop.f32.mrb[0].mxu0 }
 0x18d   : > { %v3434_v18 = vadd.f32 %v2591_v17, %v2541_v9  ;;  %v1703_v41 = vpop.f32.mrb[1].mxu0 }
 0x18e   : > { %v3436_v19 = vadd.f32 %v1703_v41, %v886_v10  ;;  %v2592_v20 = vpop.f32.mrb[2].mxu0 }
 0x18f   : > { %v1744_v21 = vpack.c.bf16 %v3434_v18, %v3434_v18  ;;  %v3440_v22 = vadd.f32 %v2592_v20, %v2542_v11  ;;  %v1706_v23 = vpop.f32.mrb[3].mxu0  ;;  %v1763_v37 = vsel %vm1759_vm6, %v3434_v18, 0.0 }
 0x190   : > { %v1742_v24 = vpack.c.bf16 %v3436_v19, %v3436_v19  ;;  %v3444_v25 = vadd.f32 %v1706_v23, %v889_v12  ;;  %v3450_v26 = vpop.f32.mrb[8].mxu1  ;;  %v1760_v29 = vsel %vm1759_vm6, %v3436_v19, 0.0 }
 0x191   : > { %1753 = vst.msk [vmem:[%s3446_s8 + $0x8] sm:$0xf] %vm1750_vm5, %v1744_v21  ;;  %v1745_v27 = vpack.c.bf16 %v3440_v22, %v3440_v22  ;;  %v1936_v28 = vpack.c.bf16 %v3450_v26, %v3450_v26  ;;  %v3460_v30 = vpop.f32.mrb[9].mxu1  ;;  %v1765_v44 = vsel %vm1759_vm6, %v3440_v22, 0.0  ;;  %v1953_v47 = vsel %vm1759_vm6, %v3450_v26, 0.0 }
 0x192   : > { %1751 = vst.msk [vmem:[%s3446_s8] sm:$0xf] %vm1750_vm5, %v1742_v24  ;;  %v1743_v31 = vpack.c.bf16 %v3444_v25, %v3444_v25  ;;  %v1761_v32 = vsel %vm1759_vm6, %v3444_v25, 0.0  ;;  %v1934_v33 = vpack.c.bf16 %v3460_v30, %v3460_v30  ;;  %v1950_v34 = vsel %vm1759_vm6, %v3460_v30, 0.0  ;;  %v3472_v35 = vpop.f32.mrb[10].mxu1 }
 0x193   : > { %1754 = vst.msk [vmem:[%s3446_s8 + $0xc] sm:$0xf] %vm1750_vm5, %v1745_v27  ;;  %v1762_v36 = vadd.f32 %v1761_v32, %v1760_v29  ;;  %1944 = vst.msk [vmem:[%s3476_s11 + $0x8] sm:$0xf] %vm1750_vm5, %v1936_v28  ;;  %v1937_v38 = vpack.c.bf16 %v3472_v35, %v3472_v35  ;;  %v3484_v39 = vpop.f32.mrb[11].mxu1  ;;  %v1955_v58 = vsel %vm1759_vm6, %v3472_v35, 0.0 }
 0x194   : > { %1752 = vst.msk [vmem:[%s3446_s8 + $0x4] sm:$0xf] %vm1750_vm5, %v1743_v31  ;;  %1942 = vst.msk [vmem:[%s3476_s11] sm:$0xf] %vm1750_vm5, %v1934_v33  ;;  %v1935_v42 = vpack.c.bf16 %v3484_v39, %v3484_v39  ;;  %v1951_v43 = vsel %vm1759_vm6, %v3484_v39, 0.0  ;;  %v2595_v46 = vpop.f32.mrb[4].mxu0 }
 0x195   : > { %v1764_v40 = vadd.f32 %v1763_v37, %v1762_v36  ;;  %1945 = vst.msk [vmem:[%s3476_s11 + $0xc] sm:$0xf] %vm1750_vm5, %v1937_v38  ;;  %v1952_v45 = vadd.f32 %v1951_v43, %v1950_v34  ;;  %v3500_v48 = vadd.f32 %v2595_v46, %v2545_v13  ;;  %v1719_v49 = vpop.f32.mrb[5].mxu0 }
 0x196   : > { %1943 = vst.msk [vmem:[%s3476_s11 + $0x4] sm:$0xf] %vm1750_vm5, %v1935_v42  ;;  %v3502_v52 = vadd.f32 %v1719_v49, %v902_v14  ;;  %v2596_v53 = vpop.f32.mrb[6].mxu0 }
 0x197   : > { %v1766_v50 = vadd.f32 %v1765_v44, %v1764_v40  ;;  %v1954_v51 = vadd.f32 %v1953_v47, %v1952_v45  ;;  %v1748_v54 = vpack.c.bf16 %v3500_v48, %v3500_v48  ;;  %v3508_v56 = vadd.f32 %v2596_v53, %v2546_v15  ;;  %v1722_v57 = vpop.f32.mrb[7].mxu0 }
 0x198   : > { %v3506_v55 = vpop.f32.mrb[12].mxu1  ;;  %v1746_v60 = vpack.c.bf16 %v3502_v52, %v3502_v52  ;;  %v1767_v61 = vsel %vm1759_vm6, %v3502_v52, 0.0  ;;  %v3543_v8 = vadd.f32 %v1722_v57, %v3432_v16  ;;  %v1771_v16 = vsel %vm1759_vm6, %v3500_v48, 0.0 }
 0x199   : > { %v1940_v59 = vpack.c.bf16 %v3506_v55, %v3506_v55  ;;  %v3518_v62 = vpop.f32.mrb[13].mxu1  ;;  %1757 = vst.msk [vmem:[%s3446_s8 + $0x18] sm:$0xf] %vm1750_vm5, %v1748_v54  ;;  %v1768_v63 = vadd.f32 %v1767_v61, %v1766_v50  ;;  %v1956_v1 = vadd.f32 %v1955_v58, %v1954_v51  ;;  %v1749_v4 = vpack.c.bf16 %v3508_v56, %v3508_v56 }
 0x19a   : > { %v1938_v0 = vpack.c.bf16 %v3518_v62, %v3518_v62  ;;  %v1957_v2 = vsel %vm1759_vm6, %v3518_v62, 0.0  ;;  %v3526_v3 = vpop.f32.mrb[14].mxu1  ;;  %1755 = vst.msk [vmem:[%s3446_s8 + $0x10] sm:$0xf] %vm1750_vm5, %v1746_v60  ;;  %v1747_v11 = vpack.c.bf16 %v3543_v8, %v3543_v8  ;;  %v1769_v12 = vsel %vm1759_vm6, %v3543_v8, 0.0 }
 0x19b   : > { %1948 = vst.msk [vmem:[%s3476_s11 + $0x18] sm:$0xf] %vm1750_vm5, %v1940_v59  ;;  %v1941_v5 = vpack.c.bf16 %v3526_v3, %v3526_v3  ;;  %v3538_v6 = vpop.f32.mrb[15].mxu1  ;;  %v1958_v7 = vadd.f32 %v1957_v2, %v1956_v1  ;;  %1758 = vst.msk [vmem:[%s3446_s8 + $0x1c] sm:$0xf] %vm1750_vm5, %v1749_v4  ;;  %v1961_v14 = vsel %vm1759_vm6, %v3506_v55, 0.0  ;;  %v1770_v15 = vadd.f32 %v1769_v12, %v1768_v63 }
 0x19c   : > { %1946 = vst.msk [vmem:[%s3476_s11 + $0x10] sm:$0xf] %vm1750_vm5, %v1938_v0  ;;  %v1939_v9 = vpack.c.bf16 %v3538_v6, %v3538_v6  ;;  %v1959_v10 = vsel %vm1759_vm6, %v3538_v6, 0.0  ;;  %1756 = vst.msk [vmem:[%s3446_s8 + $0x14] sm:$0xf] %vm1750_vm5, %v1747_v11  ;;  %v1963_v41 = vsel %vm1759_vm6, %v3526_v3, 0.0 }
 0x19d   : > { %1949 = vst.msk [vmem:[%s3476_s11 + $0x1c] sm:$0xf] %vm1750_vm5, %v1941_v5  ;;  %v1960_v13 = vadd.f32 %v1959_v10, %v1958_v7  ;;  %v1772_v20 = vadd.f32 %v1771_v16, %v1770_v15 }
 0x19e   : > { %1947 = vst.msk [vmem:[%s3476_s11 + $0x14] sm:$0xf] %vm1750_vm5, %v1939_v9 }
 0x19f   : > { %v1962_v17 = vadd.f32 %v1961_v14, %v1960_v13 }
 0x1a0   : > { %2875 = shalt.err (!%p2872_p1)
}
 0x1a1   : > { %s2876_s12 = scalar_lea.hbm %s3558_s27, 512  ;;  %s2880_s7 = scalar_lea.hbm %s3794_s3, 1024 }
 0x1a2   : > { %p2877_p3 = scmp.ne.s32.totalorder %s3558_s27, %s2876_s12  ;;  %p2881_p6 = scmp.lt.u32.totalorder %s3558_s27, %s3794_s3 }
 0x1a3   : > { %p2882_p11 = scmp.lt.u32.totalorder %s2880_s7, %s2876_s12  ;;  %p2884_p0 = scmp.lt.u32.totalorder %s2876_s12, %s3558_s27 }
 0x1a4   : > { %p2878_p2 = pnand %p2877_p3, %p3824_p13 }
 0x1a5   : > { %p2883_p12 = por %p2882_p11, %p2881_p6 }
 0x1a6   : > { %p2879_p5 = pneg %p2878_p2 }
 0x1a7   : > { %p2885_p7 = por %p2884_p0, %p2883_p12 }
 0x1a9   : > { %p2886_p8 = pnand %p2885_p7, %p2879_p5 }
 0x1ab   : > { %2889 = shalt.err (!%p2886_p8)
}
 0x1ac   : > { %s3807_s15 = smov 64   ;;  %s3808_s17 = smov 4   ;;  %v1773_v21 = vsel %vm1759_vm6, %v3508_v56, 0.0  ;;  %v1964_v23 = vadd.f32 %v1963_v41, %v1962_v17  ;;  %vm1821_vm7 = vcmask 1040384   ;;  %vm1823_vm8 = vcmask 58368  }
 0x1ad   : > { %2701 = dma.vmem_to_hbm [thread:$0]  (%p3824_p13), %s3560_s28, 512, %s3558_s27, %s2013_s18, %s3807_s15, %s3807_s15, %s3808_s17   ;;  %v1774_v24 = vadd.f32 %v1773_v21, %v1772_v20 }
 0x1ae   : > { %v1965_v27 = vrot.slane %v1964_v23, 4  ;;  %s2280_s28 = sshll.u32 %s3227_s20, 1  ;;  %s2070_s27 = sshll.u32 %s3476_s11, 4  ;;  %s3661_s27 = int_to_ptr.vmem [resolvable:$true] %s2070_s27 }
 0x1af   : > { %v1775_v28 = vrot.slane %v1774_v24, 4  ;;  %s2017_s18 = sand.u32 1, %s3098_s25   ;;  %s3806_s16 = sshll.u32 %s3098_s25, 5 }
 0x1b0   : > { %v1966_v29 = vadd.f32 %v1965_v27, %v1964_v23  ;;  %s335_s14 = scalar_lea.vmem [#allocation9], %s2280_s28  ;;  %s3669_s11 = scalar_lea.hbm %s3795_s4, %s3806_s16 }
 0x1b1   : > { %v1776_v31 = vadd.f32 %v1775_v28, %v1774_v24  ;;  %s2057_s19 = sshll.u32 %s335_s14, 4  ;;  %s3679_s8 = scalar_lea.hbm %s3796_s5, %s2455_s30  ;;  %s3671_s19 = int_to_ptr.vmem [resolvable:$true] %s2057_s19 }
 0x1b2   : > { %v1967_v32 = vrot.slane %v1966_v29, 2  ;;  %s3682_s29 = scalar_lea.vmem [#allocation12], %s2280_s28  ;;  %s3685_s13 = scalar_lea.sflag [#allocation10], %s2017_s18 }
 0x1b3   : > { %v1777_v33 = vrot.slane %v1776_v31, 2  ;;  %s2086_s12 = sshll.u32 %s3682_s29, 4  ;;  %s2890_s16 = scalar_lea.vmem %s3671_s19, 32  ;;  %s3744_s12 = int_to_ptr.vmem [resolvable:$true] %s2086_s12 }
 0x1b4   : > { %v1968_v34 = vadd.f32 %v1967_v32, %v1966_v29  ;;  %p2891_p9 = scmp.ne.s32.totalorder %s3671_s19, %s2890_s16  ;;  %s3039_s15 = smov [#allocation9]  }
 0x1b5   : > { %v1778_v36 = vadd.f32 %v1777_v33, %v1776_v31  ;;  %s2894_s17 = sshll.u32 %s3039_s15, 4  ;;  %s2895_s17 = int_to_ptr.vmem [resolvable:$false] %s2894_s17 }
 0x1b6   : > { %v1969_v37 = vrot.slane %v1968_v34, 1  ;;  %p2892_p10 = pnand %p2891_p9, %p3824_p13  ;;  %s2896_s26 = scalar_lea.vmem %s2895_s17, 64 }
 0x1b7   : > { %v1779_v38 = vrot.slane %v1778_v36, 1  ;;  %p2897_p3 = scmp.lt.s32.totalorder %s3671_s19, %s2895_s17  ;;  %p2898_p2 = scmp.lt.s32.totalorder %s2896_s26, %s2890_s16 }
 0x1b8   : > { %v1970_v40 = vadd.f32 %v1969_v37, %v1968_v34  ;;  %p2893_p1 = pneg %p2892_p10 }
 0x1b9   : > { %v1780_v42 = vadd.f32 %v1779_v38, %v1778_v36  ;;  %p2899_p5 = por %p2898_p2, %p2897_p3 }
 0x1ba   : > { %v3605_v43 = vmul.f32 0.015625, %v1970_v40 }
 0x1bb   : > { %v3607_v44 = vmul.f32 0.015625, %v1780_v42  ;;  %p2900_p6 = pnand %p2899_p5, %p2893_p1 }
 0x1bc   : > { %v1972_v45 = vsub.f32 %v3460_v30, %v3605_v43  ;;  %v1973_v46 = vsub.f32 %v3484_v39, %v3605_v43  ;;  %v1974_v47 = vsub.f32 %v3450_v26, %v3605_v43  ;;  %v1975_v49 = vsub.f32 %v3472_v35, %v3605_v43 }
 0x1bd   : > { %v1783_v50 = vsub.f32 %v3436_v19, %v3607_v44  ;;  %v1784_v51 = vsub.f32 %v3444_v25, %v3607_v44  ;;  %v1785_v53 = vsub.f32 %v3434_v18, %v3607_v44  ;;  %v1786_v30 = vsub.f32 %v3440_v22, %v3607_v44 }
 0x1be   : > { %v1787_v39 = vsub.f32 %v3502_v52, %v3607_v44  ;;  %v1788_v26 = vsub.f32 %v3543_v8, %v3607_v44  ;;  %v1789_v35 = vsub.f32 %v3500_v48, %v3607_v44  ;;  %v1790_v19 = vsub.f32 %v3508_v56, %v3607_v44 }
 0x1bf   : > { %v1792_v54 = vmul.f32 %v1783_v50, %v1783_v50  ;;  %v1793_v25 = vmul.f32 %v1784_v51, %v1784_v51  ;;  %v1794_v57 = vmul.f32 %v1785_v53, %v1785_v53  ;;  %v1795_v58 = vmul.f32 %v1786_v30, %v1786_v30 }
 0x1c0   : > { %v1796_v59 = vmul.f32 %v1787_v39, %v1787_v39  ;;  %v1976_v61 = vsub.f32 %v3518_v62, %v3605_v43  ;;  %v1977_v48 = vsub.f32 %v3538_v6, %v3605_v43  ;;  %v1978_v56 = vsub.f32 %v3506_v55, %v3605_v43 }
 0x1c1   : > { %v1800_v18 = vsel %vm1759_vm6, %v1792_v54, 0.0  ;;  %v1801_v22 = vsel %vm1759_vm6, %v1793_v25, 0.0  ;;  %v1803_v52 = vsel %vm1759_vm6, %v1794_v57, 0.0  ;;  %v1979_v0 = vsub.f32 %v3526_v3, %v3605_v43 }
 0x1c2   : > { %v1802_v60 = vadd.f32 %v1801_v22, %v1800_v18  ;;  %v1981_v1 = vmul.f32 %v1972_v45, %v1972_v45  ;;  %v1982_v2 = vmul.f32 %v1973_v46, %v1973_v46  ;;  %v1797_v4 = vmul.f32 %v1788_v26, %v1788_v26 }
 0x1c3   : > { %v1805_v5 = vsel %vm1759_vm6, %v1795_v58, 0.0  ;;  %v1983_v7 = vmul.f32 %v1974_v47, %v1974_v47  ;;  %v1798_v62 = vmul.f32 %v1789_v35, %v1789_v35  ;;  %v1807_v10 = vsel %vm1759_vm6, %v1796_v59, 0.0 }
 0x1c4   : > { %v1804_v63 = vadd.f32 %v1803_v52, %v1802_v60  ;;  %v1989_v9 = vsel %vm1759_vm6, %v1981_v1, 0.0  ;;  %v1984_v6 = vmul.f32 %v1975_v49, %v1975_v49  ;;  %v1990_v11 = vsel %vm1759_vm6, %v1982_v2, 0.0 }
 0x1c5   : > { %v1991_v12 = vadd.f32 %v1990_v11, %v1989_v9  ;;  %v1799_v13 = vmul.f32 %v1790_v19, %v1790_v19  ;;  %v1809_v3 = vsel %vm1759_vm6, %v1797_v4, 0.0  ;;  %v1985_v14 = vmul.f32 %v1976_v61, %v1976_v61 }
 0x1c6   : > { %v1806_v8 = vadd.f32 %v1805_v5, %v1804_v63  ;;  %v1992_v15 = vsel %vm1759_vm6, %v1983_v7, 0.0  ;;  %v1811_v41 = vsel %vm1759_vm6, %v1798_v62, 0.0  ;;  %v1986_v20 = vmul.f32 %v1977_v48, %v1977_v48 }
 0x1c7   : > { %v1993_v17 = vadd.f32 %v1992_v15, %v1991_v12  ;;  %v1994_v21 = vsel %vm1759_vm6, %v1984_v6, 0.0  ;;  %v1813_v27 = vsel %vm1759_vm6, %v1799_v13, 0.0  ;;  %v1987_v28 = vmul.f32 %v1978_v56, %v1978_v56 }
 0x1c8   : > { %v1808_v55 = vadd.f32 %v1807_v10, %v1806_v8  ;;  %v1996_v29 = vsel %vm1759_vm6, %v1985_v14, 0.0  ;;  %v1988_v33 = vmul.f32 %v1979_v0, %v1979_v0  ;;  %v1998_v34 = vsel %vm1759_vm6, %v1986_v20, 0.0 }
 0x1c9   : > { %v1995_v24 = vadd.f32 %v1994_v21, %v1993_v17  ;;  %v2000_v38 = vsel %vm1759_vm6, %v1987_v28, 0.0  ;;  %v1791_v39 = vmul.f32 64.0, %v3607_v44 }
 0x1ca   : > { %v1810_v16 = vadd.f32 %v1809_v3, %v1808_v55  ;;  %v2002_v45 = vsel %vm1759_vm6, %v1988_v33, 0.0 }
 0x1cb   : > { %v1997_v32 = vadd.f32 %v1996_v29, %v1995_v24 }
 0x1cc   : > { %v1812_v23 = vadd.f32 %v1811_v41, %v1810_v16 }
 0x1cd   : > { %v1999_v37 = vadd.f32 %v1998_v34, %v1997_v32 }
 0x1ce   : > { %v1814_v31 = vadd.f32 %v1813_v27, %v1812_v23 }
 0x1cf   : > { %v2001_v42 = vadd.f32 %v2000_v38, %v1999_v37 }
 0x1d0   : > { %v1815_v36 = vrot.slane %v1814_v31, 4 }
 0x1d1   : > { %v2003_v47 = vadd.f32 %v2002_v45, %v2001_v42 }
 0x1d2   : > { %v1816_v40 = vadd.f32 %v1815_v36, %v1814_v31 }
 0x1d3   : > { %v2004_v49 = vrot.slane %v2003_v47, 4 }
 0x1d4   : > { %v1817_v46 = vrot.slane %v1816_v40, 2 }
 0x1d5   : > { %v2005_v51 = vadd.f32 %v2004_v49, %v2003_v47 }
 0x1d6   : > { %v1818_v50 = vadd.f32 %v1817_v46, %v1816_v40 }
 0x1d7   : > { %v2006_v30 = vrot.slane %v2005_v51, 2 }
 0x1d8   : > { %v1819_v53 = vrot.slane %v1818_v50, 1 }
 0x1d9   : > { %v2007_v35 = vadd.f32 %v2006_v30, %v2005_v51 }
 0x1da   : > { %v1820_v26 = vadd.f32 %v1819_v53, %v1818_v50 }
 0x1db   : > { %v2008_v44 = vrot.slane %v2007_v35, 1 }
 0x1dc   : > { %v1822_v19 = vsel %vm1821_vm7, %v1791_v39, %v1820_v26 }
 0x1dd   : > { %1824 = vst.msk [vmem:[%s335_s14] sm:$0x3] %vm1823_vm8, %v1822_v19 }
 0x1de   : > { %2903 = shalt.err (!%p2900_p6)
}
 0x1df   : > { %s2904_s30 = scalar_lea.hbm %s3669_s11, 32  ;;  %s2908_s15 = scalar_lea.hbm %s3795_s4, 64 }
 0x1e0   : > { %p2905_p11 = scmp.ne.s32.totalorder %s3669_s11, %s2904_s30  ;;  %p2909_p7 = scmp.lt.u32.totalorder %s3669_s11, %s3795_s4 }
 0x1e1   : > { %p2910_p8 = scmp.lt.u32.totalorder %s2908_s15, %s2904_s30  ;;  %p2912_p10 = scmp.lt.u32.totalorder %s2904_s30, %s3669_s11 }
 0x1e2   : > { %p2906_p12 = pnand %p2905_p11, %p3824_p13 }
 0x1e3   : > { %p2911_p9 = por %p2910_p8, %p2909_p7 }
 0x1e4   : > { %p2907_p0 = pneg %p2906_p12 }
 0x1e5   : > { %p2913_p1 = por %p2912_p10, %p2911_p9 }
 0x1e7   : > { %p2914_p3 = pnand %p2913_p1, %p2907_p0 }
 0x1e9   : > { %2917 = shalt.err (!%p2914_p3)
}
 0x1ea   : > { %2702 = dma.vmem_to_hbm [thread:$0]  (%p3824_p13), %s3671_s19, 32, %s3669_s11, %s3685_s13  }
 0x1eb   : > { %s2918_s16 = scalar_lea.vmem %s3661_s27, 512  ;;  %s3040_s7 = smov [#allocation11]  }
 0x1ec   : > { %p2919_p2 = scmp.ne.s32.totalorder %s3661_s27, %s2918_s16  ;;  %s2922_s26 = sshll.u32 %s3040_s7, 4  ;;  %s2923_s26 = int_to_ptr.vmem [resolvable:$false] %s2922_s26 }
 0x1ed   : > { %s2924_s30 = scalar_lea.vmem %s2923_s26, 1024  ;;  %p2925_p11 = scmp.lt.s32.totalorder %s3661_s27, %s2923_s26 }
 0x1ee   : > { %p2920_p5 = pnand %p2919_p2, %p3824_p13  ;;  %p2926_p12 = scmp.lt.s32.totalorder %s2924_s30, %s2918_s16 }
 0x1f0   : > { %p2921_p6 = pneg %p2920_p5  ;;  %p2927_p0 = por %p2926_p12, %p2925_p11 }
 0x1f2   : > { %p2928_p7 = pnand %p2927_p0, %p2921_p6 }
 0x1f4   : > { %2931 = shalt.err (!%p2928_p7)
}
 0x1f5   : > { %s2932_s19 = scalar_lea.hbm %s3679_s8, 512  ;;  %s2936_s18 = scalar_lea.hbm %s3796_s5, 1024 }
 0x1f6   : > { %p2933_p8 = scmp.ne.s32.totalorder %s3679_s8, %s2932_s19  ;;  %p2937_p1 = scmp.lt.u32.totalorder %s3679_s8, %s3796_s5 }
 0x1f7   : > { %p2938_p3 = scmp.lt.u32.totalorder %s2936_s18, %s2932_s19  ;;  %p2940_p5 = scmp.lt.u32.totalorder %s2932_s19, %s3679_s8 }
 0x1f8   : > { %p2934_p9 = pnand %p2933_p8, %p3824_p13 }
 0x1f9   : > { %p2939_p2 = por %p2938_p3, %p2937_p1 }
 0x1fa   : > { %p2935_p10 = pneg %p2934_p9 }
 0x1fb   : > { %p2941_p6 = por %p2940_p5, %p2939_p2 }
 0x1fd   : > { %p2942_p11 = pnand %p2941_p6, %p2935_p10 }
 0x1ff   : > { %2945 = shalt.err (!%p2942_p11)
}
 0x200   : > { %s3825_s17 = smov 4   ;;  %s3826_s16 = smov 64   ;;  %v1980_v54 = vmul.f32 64.0, %v3605_v43  ;;  %v2009_v25 = vadd.f32 %v2008_v44, %v2007_v35 }
 0x201   : > { %2703 = dma.vmem_to_hbm [thread:$0]  (%p3824_p13), %s3661_s27, 512, %s3679_s8, %s3685_s13, %s3826_s16, %s3826_s16, %s3825_s17  }
 0x202   : > { %s3827_s7 = sshll.u32 %s3098_s25, 5  ;;  %v2010_v57 = vsel %vm1821_vm7, %v1980_v54, %v2009_v25  ;;  %s2028_s27 = scalar_lea.sflag [#allocation13], %s3227_s20 }
 0x203   : > { %s3740_s19 = scalar_lea.hbm %s3797_s6, %s3827_s7  ;;  %2011 = vst.msk [vmem:[%s3682_s29] sm:$0x3] %vm1823_vm8, %v2010_v57  ;;  %s2946_s8 = scalar_lea.vmem %s3744_s12, 32 }
 0x204   : > { %p2947_p12 = scmp.ne.s32.totalorder %s3744_s12, %s2946_s8  ;;  %s3041_s25 = smov [#allocation12]  }
 0x205   : > { %s2950_s13 = sshll.u32 %s3041_s25, 4  ;;  %s2951_s13 = int_to_ptr.vmem [resolvable:$false] %s2950_s13 }
 0x206   : > { %p2948_p0 = pnand %p2947_p12, %p3824_p13  ;;  %s2952_s11 = scalar_lea.vmem %s2951_s13, 64 }
 0x207   : > { %p2953_p8 = scmp.lt.s32.totalorder %s3744_s12, %s2951_s13  ;;  %p2954_p9 = scmp.lt.s32.totalorder %s2952_s11, %s2946_s8 }
 0x208   : > { %p2949_p7 = pneg %p2948_p0 }
 0x209   : > { %p2955_p10 = por %p2954_p9, %p2953_p8 }
 0x20b   : > { %p2956_p1 = pnand %p2955_p10, %p2949_p7 }
 0x20d   : > { %2959 = shalt.err (!%p2956_p1)
}
 0x20e   : > { %s2960_s20 = scalar_lea.hbm %s3740_s19, 32  ;;  %s2964_s18 = scalar_lea.hbm %s3797_s6, 64 }
 0x20f   : > { %p2961_p3 = scmp.ne.s32.totalorder %s3740_s19, %s2960_s20  ;;  %p2965_p6 = scmp.lt.u32.totalorder %s3740_s19, %s3797_s6 }
 0x210   : > { %p2966_p11 = scmp.lt.u32.totalorder %s2964_s18, %s2960_s20  ;;  %p2968_p0 = scmp.lt.u32.totalorder %s2960_s20, %s3740_s19 }
 0x211   : > { %p2962_p2 = pnand %p2961_p3, %p3824_p13 }
 0x212   : > { %p2967_p12 = por %p2966_p11, %p2965_p6 }
 0x213   : > { %p2963_p5 = pneg %p2962_p2 }
 0x214   : > { %p2969_p7 = por %p2968_p0, %p2967_p12 }
 0x216   : > { %p2970_p8 = pnand %p2969_p7, %p2963_p5 }
 0x218   : > { %2973 = shalt.err (!%p2970_p8)
}
 0x219   : > { %2704 = dma.vmem_to_hbm [thread:$0]  (%p3824_p13), %s3744_s12, 32, %s3740_s19, %s2028_s27  }
 0x21a PF: > { %s2098_s17 = sand.u32 1, %s3012_s21   ;;  %p3828_p9 = scmp.ne.s32.totalorder %s3814_s10, 0 }
 0x21b   : > { %s2099_s16 = scalar_lea.sflag [#allocation4], %s2098_s17 }
 0x21c   : > { %p2717_p10 = pnand %p2272_p4, %p3828_p9 }
 0x21e   : > { %2999 = dma.done.wait (!%p2717_p10), %s2099_s16, 512  }
 0x21f   : > { %3001 = vsyncadd (!%p2717_p10), %s2099_s16, 4294966784  ;;  %s3829_s7 = sadd.s32 4294967294, %s3024_s24  }
 0x220   : > { %s2107_s26 = sand.u32 1, %s3829_s7  }
 0x221   : > { %s2108_s30 = scalar_lea.sflag [#allocation10], %s2107_s26 }
 0x222   : > { %3003 = dma.done.wait (!%p2717_p10), %s2108_s30, 544  }
 0x223   : > { %3005 = vsyncadd (!%p2717_p10), %s2108_s30, 4294966752  ;;  %s2126_s9 = scalar_lea.sflag [#allocation13], %s2098_s17 }
 0x224   : > { %3007 = dma.done.wait (!%p2717_p10), %s2126_s9, 32  }
 0x225   : > { %3009 = vsyncadd (!%p2717_p10), %s2126_s9, 4294967264  ;;  %s3830_s24 = sld [smem:[#allocation22_spill]]  ;;  %s3831_s12 = sld [smem:[#allocation23_spill]] }
 0x226   : > { %s3832_s21 = smov %s3016_s22  ;;  %s3833_s22 = smov %s3020_s23 }
 0x22b   : > { %p27_p13 = scmp.ge.s32.totalorder %s3830_s24, 4   ;;  %s3834_s23 = smov %s3831_s12 }
 0x22d   :  { %29 = sbr.rel (!%p27_p13) target bundleno = 10 (0xa), region = 152 }
 0x234   :  { %2131 = vsyncpa [#allocation3], 1 }
 0x235   :  { %2133 = vsyncpa [#allocation3 + $0x1], 1 }
 0x236   :  { %2134 = vsyncpa [#allocation6], 1 }
 0x237   :  { %2135 = vsyncpa [#allocation4], 1 }
 0x238   :  { %2137 = vsyncpa [#allocation4 + $0x1], 1 }
 0x239   :  { %2138 = vsyncpa [#allocation10], 1 }
 0x23a   :  { %2140 = vsyncpa [#allocation10 + $0x1], 1 }
 0x23b   :  { %2141 = vsyncpa [#allocation13], 1 }
 0x23c   :  { %2143 = vsyncpa [#allocation13 + $0x1], 1 }

</bundles_post_ra>
